<compile_context>
chip_gen: v7x
topology: tpu7x:2x2x1
jax: 0.10.0
libtpu: 0.0.40
codegen_flags: <defaults>
</compile_context>

<pallas_src>
import functools

import jax
import jax.numpy as jnp
from jax.experimental import pallas as pl
from jax.experimental.pallas import tpu as pltpu

TM_MAX = 256        # GEMM row tile
TK_MAX = 512        # GEMM reduction tile
LRELU_SLOPE = 0.2
BN_EPS = 1e-5
KW = 4              # conv kernel size (kw in the module)
PADW = 1            # conv padding
VMEM_LIMIT = 32 * 1024 * 1024


def _round_up(x, m):
    return (x + m - 1) // m * m


# ----------------------------------------------------------------------------
# Pallas kernels
# ----------------------------------------------------------------------------
def _conv_gemm_kernel(*refs, has_bias, apply_lrelu, compute_stats):
    """K-tiled im2col GEMM with fused bias / LeakyReLU / BN-stat epilogue.

    refs = (a, b, [bias], out, [sum, sumsq], acc_scratch)
      a:   (TM, TK)  bf16   im2col patches tile
      b:   (TK, Np)  bf16   weight tile
      out: (TM, Np)  f32/bf16
      sum/sumsq: (1, Np) f32 accumulators (resident across the whole grid)
      acc: (TM, Np)  f32 VMEM scratch
    """
    it = iter(refs)
    a_ref = next(it)
    b_ref = next(it)
    bias_ref = next(it) if has_bias else None
    o_ref = next(it)
    sum_ref = next(it) if compute_stats else None
    ssq_ref = next(it) if compute_stats else None
    acc_ref = next(it)

    i = pl.program_id(0)
    k = pl.program_id(1)
    nk = pl.num_programs(1)

    @pl.when(k == 0)
    def _():
        acc_ref[...] = jnp.zeros_like(acc_ref)

    acc_ref[...] += jnp.dot(a_ref[...], b_ref[...],
                            preferred_element_type=jnp.float32)

    if compute_stats:
        @pl.when(jnp.logical_and(i == 0, k == 0))
        def _():
            sum_ref[...] = jnp.zeros_like(sum_ref)
            ssq_ref[...] = jnp.zeros_like(ssq_ref)

    @pl.when(k == nk - 1)
    def _():
        y = acc_ref[...]
        if has_bias:
            y = y + bias_ref[...]
        if apply_lrelu:
            y = jnp.where(y >= 0, y, LRELU_SLOPE * y)
        o_ref[...] = y.astype(o_ref.dtype)
        if compute_stats:
            # Padded rows of A are zero and BN layers have no bias, so they
            # contribute exactly 0 to both accumulators.
            sum_ref[...] = sum_ref[...] + jnp.sum(y, axis=0, keepdims=True)
            ssq_ref[...] = ssq_ref[...] + jnp.sum(y * y, axis=0, keepdims=True)


def _bn_lrelu_kernel(x_ref, scale_ref, shift_ref, o_ref):
    """Fused per-channel affine (folded BatchNorm) + LeakyReLU(0.2)."""
    y = x_ref[...] * scale_ref[...] + shift_ref[...]
    o_ref[...] = jnp.where(y >= 0, y, LRELU_SLOPE * y).astype(o_ref.dtype)


# ----------------------------------------------------------------------------
# Pallas wrappers
# ----------------------------------------------------------------------------
def conv_gemm(patches, w_pad, bias_pad, *, apply_lrelu, compute_stats, out_dtype):
    """patches: [M, K], w_pad: [Kp, Np] bf16 (pre-padded), bias_pad: [1, Np] f32 | None.

    Returns (y_padded [Mp, Np], sum [1, Np] | None, sumsq [1, Np] | None).
    """
    M, K = patches.shape
    Kp, Np = w_pad.shape

    # M tiling (round to 16 so bf16 sublane packing is always aligned).
    if M <= TM_MAX:
        tm = _round_up(M, 16)
        Mp = tm
    else:
        tm = TM_MAX
        Mp = _round_up(M, tm)

    # K tiling.
    if Kp <= TK_MAX:
        tk = Kp
    elif Kp % TK_MAX == 0:
        tk = TK_MAX
    elif Kp % 256 == 0:
        tk = 256
    else:
        tk = 128

    nm, nk = Mp // tm, Kp // tk

    a = jnp.zeros((Mp, Kp), jnp.bfloat16).at[:M, :K].set(
        patches.astype(jnp.bfloat16))

    has_bias = bias_pad is not None
    kernel = functools.partial(_conv_gemm_kernel, has_bias=has_bias,
                               apply_lrelu=apply_lrelu,
                               compute_stats=compute_stats)

    in_specs = [
        pl.BlockSpec((tm, tk), lambda i, k: (i, k)),
        pl.BlockSpec((tk, Np), lambda i, k: (k, 0)),
    ]
    operands = [a, w_pad]
    if has_bias:
        in_specs.append(pl.BlockSpec((1, Np), lambda i, k: (0, 0)))
        operands.append(bias_pad)

    out_shapes = [jax.ShapeDtypeStruct((Mp, Np), out_dtype)]
    out_specs = [pl.BlockSpec((tm, Np), lambda i, k: (i, 0))]
    if compute_stats:
        out_shapes += [jax.ShapeDtypeStruct((1, Np), jnp.float32)] * 2
        out_specs += [pl.BlockSpec((1, Np), lambda i, k: (0, 0))] * 2

    # Stats accumulators are shared across the M axis -> it must not be split
    # across cores; otherwise M is parallel.
    m_sem = "arbitrary" if compute_stats else "parallel"

    outs = pl.pallas_call(
        kernel,
        out_shape=tuple(out_shapes),
        grid=(nm, nk),
        in_specs=in_specs,
        out_specs=tuple(out_specs),
        scratch_shapes=[pltpu.VMEM((tm, Np), jnp.float32)],
        compiler_params=pltpu.CompilerParams(
            dimension_semantics=(m_sem, "arbitrary"),
            vmem_limit_bytes=VMEM_LIMIT),
    )(*operands)

    if compute_stats:
        return outs[0], outs[1], outs[2]
    return outs[0], None, None


def bn_lrelu(y_pad, scale_pad, shift_pad, out_dtype=jnp.bfloat16):
    """y_pad: [Mp, Np] f32 (already padded); per-channel scale/shift; bf16 out."""
    Mp, Np = y_pad.shape
    if Mp <= 512:
        tm = Mp
    elif Mp % 512 == 0:
        tm = 512
    else:
        tm = 256

    out = pl.pallas_call(
        _bn_lrelu_kernel,
        out_shape=jax.ShapeDtypeStruct((Mp, Np), out_dtype),
        grid=(Mp // tm,),
        in_specs=[
            pl.BlockSpec((tm, Np), lambda i: (i, 0)),
            pl.BlockSpec((1, Np), lambda i: (0, 0)),
            pl.BlockSpec((1, Np), lambda i: (0, 0)),
        ],
        out_specs=pl.BlockSpec((tm, Np), lambda i: (i, 0)),
        compiler_params=pltpu.CompilerParams(
            dimension_semantics=("parallel",),
            vmem_limit_bytes=VMEM_LIMIT),
    )(y_pad, scale_pad, shift_pad)
    return out


# ----------------------------------------------------------------------------
# Glue: im2col, parameter init, full forward
# ----------------------------------------------------------------------------
# TODO(synk): build im2col patches inside the GEMM kernel (tap grid axis or manual
# DMA of strided windows) to remove the 16x HBM expansion; kept as a fused XLA
# producer here for robustness.
def im2col(x_nhwc, kh, kw, stride, pad):
    xp = jnp.pad(x_nhwc, ((0, 0), (pad, pad), (pad, pad), (0, 0)))
    Nb, H, W, C = xp.shape
    oh = (H - kh) // stride + 1
    ow = (W - kw) // stride + 1
    cols = []
    for i in range(kh):
        for j in range(kw):
            cols.append(xp[:, i:i + stride * oh:stride, j:j + stride * ow:stride, :])
    p = jnp.stack(cols, axis=3)                      # (N, oh, ow, kh*kw, C)
    return p.reshape(Nb * oh * ow, kh * kw * C), oh, ow


def _prep_conv(w, b):
    """Pre-transpose/pad/cast a PyTorch-layout conv weight once, at init."""
    cout, cin = w.shape[0], w.shape[1]
    K = cin * KW * KW
    Kp = _round_up(K, 128)
    Np = _round_up(cout, 128)
    w_km = jnp.transpose(w, (2, 3, 1, 0)).reshape(K, cout)   # matches im2col order
    w_pad = jnp.zeros((Kp, Np), jnp.bfloat16).at[:K, :cout].set(
        w_km.astype(jnp.bfloat16))
    b_pad = None
    if b is not None:
        b_pad = jnp.zeros((1, Np), jnp.float32).at[:, :cout].set(b[None, :])
    return w_pad, b_pad, cout


def init_params(key, input_nc, ndf=64, n_layers=3):
    """Deterministic synthetic weights following the shapes in __init__."""
    keys = iter(jax.random.split(key, 4 * (n_layers + 2)))

    def conv_w(cout, cin):
        return 0.02 * jax.random.normal(next(keys), (cout, cin, KW, KW), jnp.float32)

    layers = []
    # first conv: has bias, LeakyReLU fused, no norm
    w = conv_w(ndf, input_nc)
    b = 0.02 * jax.random.normal(next(keys), (ndf,), jnp.float32)
    w_pad, b_pad, cout = _prep_conv(w, b)
    layers.append(dict(w_pad=w_pad, b_pad=b_pad, cout=cout, stride=2,
                       bn=False, fuse_lrelu=True, gamma=None, beta=None))

    nf_mult = 1
    for n in range(1, n_layers):
        nf_prev, nf_mult = nf_mult, min(2 ** n, 8)
        c_out = ndf * nf_mult
        w_pad, _, cout = _prep_conv(conv_w(c_out, ndf * nf_prev), None)
        layers.append(dict(w_pad=w_pad, b_pad=None, cout=cout, stride=2,
                           bn=True, fuse_lrelu=False,
                           gamma=jnp.ones((c_out,), jnp.float32),   # BN default init
                           beta=jnp.zeros((c_out,), jnp.float32)))

    nf_prev, nf_mult = nf_mult, min(2 ** n_layers, 8)
    c_out = ndf * nf_mult
    w_pad, _, cout = _prep_conv(conv_w(c_out, ndf * nf_prev), None)
    layers.append(dict(w_pad=w_pad, b_pad=None, cout=cout, stride=1,
                       bn=True, fuse_lrelu=False,
                       gamma=jnp.ones((c_out,), jnp.float32),
                       beta=jnp.zeros((c_out,), jnp.float32)))

    # final conv: C -> 1, has bias, no norm, no activation (use_sigmoid=False)
    w = conv_w(1, c_out)
    b = 0.02 * jax.random.normal(next(keys), (1,), jnp.float32)
    w_pad, b_pad, cout = _prep_conv(w, b)
    layers.append(dict(w_pad=w_pad, b_pad=b_pad, cout=cout, stride=1,
                       bn=False, fuse_lrelu=False, gamma=None, beta=None))
    return layers


def nlayer_discriminator_forward(x_nchw, params):
    # NCHW -> NHWC; activations flow in bf16 (GEMM operand dtype), stats in f32.
    x = jnp.transpose(x_nchw, (0, 2, 3, 1)).astype(jnp.bfloat16)
    nb = x_nchw.shape[0]
    last = params[-1]

    for layer in params:
        patches, oh, ow = im2col(x, KW, KW, layer["stride"], PADW)
        M = patches.shape[0]
        cout = layer["cout"]

        if layer["bn"]:
            # Conv GEMM with fused per-channel sum / sum-of-squares epilogue.
            y_pad, ssum, ssq = conv_gemm(
                patches, layer["w_pad"], None,
                apply_lrelu=False, compute_stats=True, out_dtype=jnp.float32)

            # BatchNorm2d training-mode stats over (N, H, W) per channel (biased var).
            s = ssum[0, :cout]
            sq = ssq[0, :cout]
            mean = s / M
            var = jnp.maximum(sq / M - mean * mean, 0.0)
            scale = layer["gamma"] / jnp.sqrt(var + BN_EPS)
            shift = layer["beta"] - mean * scale

            Np = y_pad.shape[1]
            scale_pad = jnp.zeros((1, Np), jnp.float32).at[:, :cout].set(scale[None, :])
            shift_pad = jnp.zeros((1, Np), jnp.float32).at[:, :cout].set(shift[None, :])

            # Fused affine + LeakyReLU directly on the padded slab, bf16 out.
            y_pad = bn_lrelu(y_pad, scale_pad, shift_pad, out_dtype=jnp.bfloat16)
            x = y_pad[:M, :cout].reshape(nb, oh, ow, cout)
        else:
            is_last = layer is last
            out_dtype = jnp.float32 if is_last else jnp.bfloat16
            y_pad, _, _ = conv_gemm(
                patches, layer["w_pad"], layer["b_pad"],
                apply_lrelu=layer["fuse_lrelu"], compute_stats=False,
                out_dtype=out_dtype)
            x = y_pad[:M, :cout].reshape(nb, oh, ow, cout)

    return jnp.transpose(x, (0, 3, 1, 2))                     # NHWC -> NCHW


if __name__ == "__main__":
    key = jax.random.PRNGKey(0)
    k_param, k_input = jax.random.split(key)

    # small but valid config: 3 stride-2 convs + 2 stride-1 k=4 convs need H,W >= 32
    batch, input_nc, H, W = 2, 4, 32, 32
    ndf, n_layers = 16, 3

    params = init_params(k_param, input_nc=input_nc, ndf=ndf, n_layers=n_layers)
    x = jax.random.normal(k_input, (batch, input_nc, H, W), jnp.float32)

    fwd = jax.jit(lambda inp: nlayer_discriminator_forward(inp, params))
    out = fwd(x)
    out = jax.block_until_ready(out)

    # 32 -> 16 -> 8 -> 4 -> 3 -> 2, single output channel (PatchGAN logits)
    assert out.shape == (batch, 1, 2, 2), out.shape
    assert out.dtype == jnp.float32
    print("KERNEL_OK")
</pallas_src>

<mosaic_0001>
module attributes {stable_mosaic.version = 11 : i64} {
  func.func @_conv_gemm_kernel(%arg0: i32, %arg1: i32, %arg2: memref<256x128xbf16, #tpu.memory_space<vmem>>, %arg3: memref<128x128xbf16, #tpu.memory_space<vmem>>, %arg4: memref<1x128xf32, #tpu.memory_space<vmem>>, %arg5: memref<256x128xbf16, #tpu.memory_space<vmem>>, %arg6: memref<256x128xf32, #tpu.memory_space<vmem>>) attributes {dimension_semantics = [#tpu.dimension_semantics<parallel>, #tpu.dimension_semantics<arbitrary>], iteration_bounds = array<i64: 2, 1>, scalar_prefetch = 0 : i64, scratch_operands = 1 : i64, tpu.core_type = #tpu.core_type<tc>, window_params = [{transform_indices = @transform_0, window_bounds = array<i64: 256, 128>}, {transform_indices = @transform_1, window_bounds = array<i64: 128, 128>}, {pipeline_mode = #tpu.pipeline_mode<synchronous>, transform_indices = @transform_2, window_bounds = array<i64: 1, 128>}, {transform_indices = @transform_3, window_bounds = array<i64: 256, 128>}]} {
    %c0_i32 = arith.constant 0 : i32
    %0 = arith.cmpi eq, %arg1, %c0_i32 : i32
    %1 = arith.extui %0 : i1 to i32
    %c0_i32_0 = arith.constant 0 : i32
    %2 = arith.cmpi ne, %1, %c0_i32_0 : i32
    scf.if %2 {
      %cst_10 = arith.constant 0.000000e+00 : f32
      %12 = vector.broadcast %cst_10 : f32 to vector<256x128xf32>
      %c0_11 = arith.constant 0 : index
      %c0_12 = arith.constant 0 : index
      %13 = vector.load %arg6[%c0_11, %c0_12] : memref<256x128xf32, #tpu.memory_space<vmem>>, vector<256x128xf32>
      tpu.vector_store %arg6[%c0_11, %c0_12], %12 {strides = array<i32>} : memref<256x128xf32, #tpu.memory_space<vmem>>, vector<256x128xf32>,
    } else {
    }
    %c0 = arith.constant 0 : index
    %c0_1 = arith.constant 0 : index
    %3 = vector.load %arg6[%c0, %c0_1] : memref<256x128xf32, #tpu.memory_space<vmem>>, vector<256x128xf32>
    %c0_2 = arith.constant 0 : index
    %c0_3 = arith.constant 0 : index
    %4 = vector.load %arg2[%c0_2, %c0_3] : memref<256x128xbf16, #tpu.memory_space<vmem>>, vector<256x128xbf16>
    %c0_4 = arith.constant 0 : index
    %c0_5 = arith.constant 0 : index
    %5 = vector.load %arg3[%c0_4, %c0_5] : memref<128x128xbf16, #tpu.memory_space<vmem>>, vector<128x128xbf16>
    %cst = arith.constant dense<0.000000e+00> : vector<256x128xf32>
    %6 = tpu.matmul %4, %5, %cst {dimension_numbers = #tpu.dot_dimension_numbers<[1], [0], [0], [1], [0, 0, 1, 1], [], []>} : vector<256x128xbf16>, vector<128x128xbf16>, vector<256x128xf32> -> vector<256x128xf32>
    %7 = arith.addf %3, %6 : vector<256x128xf32>
    %c0_6 = arith.constant 0 : index
    %c0_7 = arith.constant 0 : index
    %8 = vector.load %arg6[%c0_6, %c0_7] : memref<256x128xf32, #tpu.memory_space<vmem>>, vector<256x128xf32>
    tpu.vector_store %arg6[%c0_6, %c0_7], %7 {strides = array<i32>} : memref<256x128xf32, #tpu.memory_space<vmem>>, vector<256x128xf32>,
    %c0_i32_8 = arith.constant 0 : i32
    %9 = arith.cmpi eq, %arg1, %c0_i32_8 : i32
    %10 = arith.extui %9 : i1 to i32
    %c0_i32_9 = arith.constant 0 : i32
    %11 = arith.cmpi ne, %10, %c0_i32_9 : i32
    scf.if %11 {
      %c0_10 = arith.constant 0 : index
      %c0_11 = arith.constant 0 : index
      %12 = vector.load %arg6[%c0_10, %c0_11] : memref<256x128xf32, #tpu.memory_space<vmem>>, vector<256x128xf32>
      %c0_12 = arith.constant 0 : index
      %c0_13 = arith.constant 0 : index
      %13 = vector.load %arg4[%c0_12, %c0_13] : memref<1x128xf32, #tpu.memory_space<vmem>>, vector<1x128xf32>
      %14 = vector.broadcast %13 : vector<1x128xf32> to vector<256x128xf32>
      %15 = arith.addf %12, %14 : vector<256x128xf32>
      %cst_14 = arith.constant 0.000000e+00 : f32
      %16 = vector.broadcast %cst_14 : f32 to vector<256x128xf32>
      %17 = arith.cmpf oge, %15, %16 : vector<256x128xf32>
      %cst_15 = arith.constant 2.000000e-01 : f32
      %18 = vector.broadcast %cst_15 : f32 to vector<256x128xf32>
      %19 = arith.mulf %18, %15 : vector<256x128xf32>
      %20 = arith.select %17, %15, %19 : vector<256x128xi1>, vector<256x128xf32>
      %21 = arith.truncf %20 : vector<256x128xf32> to vector<256x128xbf16>
      %c0_16 = arith.constant 0 : index
      %c0_17 = arith.constant 0 : index
      %22 = vector.load %arg5[%c0_16, %c0_17] : memref<256x128xbf16, #tpu.memory_space<vmem>>, vector<256x128xbf16>
      tpu.vector_store %arg5[%c0_16, %c0_17], %21 {strides = array<i32>} : memref<256x128xbf16, #tpu.memory_space<vmem>>, vector<256x128xbf16>,
    } else {
    }
    return
  }
  func.func @transform_0(%arg0: i32, %arg1: i32) -> (i32, i32) {
    %c0_i32 = arith.constant 0 : i32
    return %arg0, %arg1 : i32, i32
  }
  func.func @transform_1(%arg0: i32, %arg1: i32) -> (i32, i32) {
    %c0_i32 = arith.constant 0 : i32
    %c0_i32_0 = arith.constant 0 : i32
    return %arg1, %c0_i32 : i32, i32
  }
  func.func @transform_2(%arg0: i32, %arg1: i32) -> (i32, i32) {
    %c0_i32 = arith.constant 0 : i32
    %c0_i32_0 = arith.constant 0 : i32
    %c0_i32_1 = arith.constant 0 : i32
    return %c0_i32, %c0_i32_0 : i32, i32
  }
  func.func @transform_3(%arg0: i32, %arg1: i32) -> (i32, i32) {
    %c0_i32 = arith.constant 0 : i32
    %c0_i32_0 = arith.constant 0 : i32
    return %arg0, %c0_i32 : i32, i32
  }
}

module attributes {stable_mosaic.version = 11 : i64} {
  func.func @_conv_gemm_kernel(%arg0: i32, %arg1: i32, %arg2: memref<128x256xbf16, #tpu.memory_space<vmem>>, %arg3: memref<256x128xbf16, #tpu.memory_space<vmem>>, %arg4: memref<128x128xf32, #tpu.memory_space<vmem>>, %arg5: memref<1x128xf32, #tpu.memory_space<vmem>>, %arg6: memref<1x128xf32, #tpu.memory_space<vmem>>, %arg7: memref<128x128xf32, #tpu.memory_space<vmem>>) attributes {dimension_semantics = [#tpu.dimension_semantics<arbitrary>, #tpu.dimension_semantics<arbitrary>], iteration_bounds = array<i64: 1, 1>, scalar_prefetch = 0 : i64, scratch_operands = 1 : i64, tpu.core_type = #tpu.core_type<tc>, window_params = [{transform_indices = @transform_0, window_bounds = array<i64: 128, 256>}, {transform_indices = @transform_1, window_bounds = array<i64: 256, 128>}, {transform_indices = @transform_2, window_bounds = array<i64: 128, 128>}, {pipeline_mode = #tpu.pipeline_mode<synchronous>, transform_indices = @transform_3, window_bounds = array<i64: 1, 128>}, {pipeline_mode = #tpu.pipeline_mode<synchronous>, transform_indices = @transform_4, window_bounds = array<i64: 1, 128>}]} {
    %c0_i32 = arith.constant 0 : i32
    %0 = arith.cmpi eq, %arg1, %c0_i32 : i32
    %1 = arith.extui %0 : i1 to i32
    %c0_i32_0 = arith.constant 0 : i32
    %2 = arith.cmpi ne, %1, %c0_i32_0 : i32
    scf.if %2 {
      %cst_13 = arith.constant 0.000000e+00 : f32
      %17 = vector.broadcast %cst_13 : f32 to vector<128x128xf32>
      %c0_14 = arith.constant 0 : index
      %c0_15 = arith.constant 0 : index
      %18 = vector.load %arg7[%c0_14, %c0_15] : memref<128x128xf32, #tpu.memory_space<vmem>>, vector<128x128xf32>
      tpu.vector_store %arg7[%c0_14, %c0_15], %17 {strides = array<i32>} : memref<128x128xf32, #tpu.memory_space<vmem>>, vector<128x128xf32>,
    } else {
    }
    %c0 = arith.constant 0 : index
    %c0_1 = arith.constant 0 : index
    %3 = vector.load %arg7[%c0, %c0_1] : memref<128x128xf32, #tpu.memory_space<vmem>>, vector<128x128xf32>
    %c0_2 = arith.constant 0 : index
    %c0_3 = arith.constant 0 : index
    %4 = vector.load %arg2[%c0_2, %c0_3] : memref<128x256xbf16, #tpu.memory_space<vmem>>, vector<128x256xbf16>
    %c0_4 = arith.constant 0 : index
    %c0_5 = arith.constant 0 : index
    %5 = vector.load %arg3[%c0_4, %c0_5] : memref<256x128xbf16, #tpu.memory_space<vmem>>, vector<256x128xbf16>
    %cst = arith.constant dense<0.000000e+00> : vector<128x128xf32>
    %6 = tpu.matmul %4, %5, %cst {dimension_numbers = #tpu.dot_dimension_numbers<[1], [0], [0], [1], [0, 0, 1, 1], [], []>} : vector<128x256xbf16>, vector<256x128xbf16>, vector<128x128xf32> -> vector<128x128xf32>
    %7 = arith.addf %3, %6 : vector<128x128xf32>
    %c0_6 = arith.constant 0 : index
    %c0_7 = arith.constant 0 : index
    %8 = vector.load %arg7[%c0_6, %c0_7] : memref<128x128xf32, #tpu.memory_space<vmem>>, vector<128x128xf32>
    tpu.vector_store %arg7[%c0_6, %c0_7], %7 {strides = array<i32>} : memref<128x128xf32, #tpu.memory_space<vmem>>, vector<128x128xf32>,
    %c0_i32_8 = arith.constant 0 : i32
    %9 = arith.cmpi eq, %arg0, %c0_i32_8 : i32
    %c0_i32_9 = arith.constant 0 : i32
    %10 = arith.cmpi eq, %arg1, %c0_i32_9 : i32
    %11 = arith.andi %9, %10 : i1
    %12 = arith.extui %11 : i1 to i32
    %c0_i32_10 = arith.constant 0 : i32
    %13 = arith.cmpi ne, %12, %c0_i32_10 : i32
    scf.if %13 {
      %cst_13 = arith.constant 0.000000e+00 : f32
      %17 = vector.broadcast %cst_13 : f32 to vector<1x128xf32>
      %c0_14 = arith.constant 0 : index
      %c0_15 = arith.constant 0 : index
      %18 = vector.load %arg5[%c0_14, %c0_15] : memref<1x128xf32, #tpu.memory_space<vmem>>, vector<1x128xf32>
      tpu.vector_store %arg5[%c0_14, %c0_15], %17 {strides = array<i32>} : memref<1x128xf32, #tpu.memory_space<vmem>>, vector<1x128xf32>,
      %cst_16 = arith.constant 0.000000e+00 : f32
      %19 = vector.broadcast %cst_16 : f32 to vector<1x128xf32>
      %c0_17 = arith.constant 0 : index
      %c0_18 = arith.constant 0 : index
      %20 = vector.load %arg6[%c0_17, %c0_18] : memref<1x128xf32, #tpu.memory_space<vmem>>, vector<1x128xf32>
      tpu.vector_store %arg6[%c0_17, %c0_18], %19 {strides = array<i32>} : memref<1x128xf32, #tpu.memory_space<vmem>>, vector<1x128xf32>,
    } else {
    }
    %c0_i32_11 = arith.constant 0 : i32
    %14 = arith.cmpi eq, %arg1, %c0_i32_11 : i32
    %15 = arith.extui %14 : i1 to i32
    %c0_i32_12 = arith.constant 0 : i32
    %16 = arith.cmpi ne, %15, %c0_i32_12 : i32
    scf.if %16 {
      %c0_13 = arith.constant 0 : index
      %c0_14 = arith.constant 0 : index
      %17 = vector.load %arg7[%c0_13, %c0_14] : memref<128x128xf32, #tpu.memory_space<vmem>>, vector<128x128xf32>
      %c0_15 = arith.constant 0 : index
      %c0_16 = arith.constant 0 : index
      %18 = vector.load %arg4[%c0_15, %c0_16] : memref<128x128xf32, #tpu.memory_space<vmem>>, vector<128x128xf32>
      tpu.vector_store %arg4[%c0_15, %c0_16], %17 {strides = array<i32>} : memref<128x128xf32, #tpu.memory_space<vmem>>, vector<128x128xf32>,
      %c0_17 = arith.constant 0 : index
      %c0_18 = arith.constant 0 : index
      %19 = vector.load %arg5[%c0_17, %c0_18] : memref<1x128xf32, #tpu.memory_space<vmem>>, vector<1x128xf32>
      %cst_19 = arith.constant dense<0.000000e+00> : vector<128xf32>
      %20 = vector.multi_reduction <add>, %17, %cst_19 [0] : vector<128x128xf32> to vector<128xf32>
      %21 = vector.shape_cast %20 : vector<128xf32> to vector<1x128xf32>
      %22 = arith.addf %19, %21 : vector<1x128xf32>
      %c0_20 = arith.constant 0 : index
      %c0_21 = arith.constant 0 : index
      %23 = vector.load %arg5[%c0_20, %c0_21] : memref<1x128xf32, #tpu.memory_space<vmem>>, vector<1x128xf32>
      tpu.vector_store %arg5[%c0_20, %c0_21], %22 {strides = array<i32>} : memref<1x128xf32, #tpu.memory_space<vmem>>, vector<1x128xf32>,
      %c0_22 = arith.constant 0 : index
      %c0_23 = arith.constant 0 : index
      %24 = vector.load %arg6[%c0_22, %c0_23] : memref<1x128xf32, #tpu.memory_space<vmem>>, vector<1x128xf32>
      %25 = arith.mulf %17, %17 : vector<128x128xf32>
      %cst_24 = arith.constant dense<0.000000e+00> : vector<128xf32>
      %26 = vector.multi_reduction <add>, %25, %cst_24 [0] : vector<128x128xf32> to vector<128xf32>
      %27 = vector.shape_cast %26 : vector<128xf32> to vector<1x128xf32>
      %28 = arith.addf %24, %27 : vector<1x128xf32>
      %c0_25 = arith.constant 0 : index
      %c0_26 = arith.constant 0 : index
      %29 = vector.load %arg6[%c0_25, %c0_26] : memref<1x128xf32, #tpu.memory_space<vmem>>, vector<1x128xf32>
      tpu.vector_store %arg6[%c0_25, %c0_26], %28 {strides = array<i32>} : memref<1x128xf32, #tpu.memory_space<vmem>>, vector<1x128xf32>,
    } else {
    }
    return
  }
  func.func @transform_0(%arg0: i32, %arg1: i32) -> (i32, i32) {
    %c0_i32 = arith.constant 0 : i32
    return %arg0, %arg1 : i32, i32
  }
  func.func @transform_1(%arg0: i32, %arg1: i32) -> (i32, i32) {
    %c0_i32 = arith.constant 0 : i32
    %c0_i32_0 = arith.constant 0 : i32
    return %arg1, %c0_i32 : i32, i32
  }
  func.func @transform_2(%arg0: i32, %arg1: i32) -> (i32, i32) {
    %c0_i32 = arith.constant 0 : i32
    %c0_i32_0 = arith.constant 0 : i32
    return %arg0, %c0_i32 : i32, i32
  }
  func.func @transform_3(%arg0: i32, %arg1: i32) -> (i32, i32) {
    %c0_i32 = arith.constant 0 : i32
    %c0_i32_0 = arith.constant 0 : i32
    %c0_i32_1 = arith.constant 0 : i32
    return %c0_i32, %c0_i32_0 : i32, i32
  }
  func.func @transform_4(%arg0: i32, %arg1: i32) -> (i32, i32) {
    %c0_i32 = arith.constant 0 : i32
    %c0_i32_0 = arith.constant 0 : i32
    %c0_i32_1 = arith.constant 0 : i32
    return %c0_i32, %c0_i32_0 : i32, i32
  }
}

module attributes {stable_mosaic.version = 11 : i64} {
  func.func @_bn_lrelu_kernel(%arg0: i32, %arg1: memref<128x128xf32, #tpu.memory_space<vmem>>, %arg2: memref<1x128xf32, #tpu.memory_space<vmem>>, %arg3: memref<1x128xf32, #tpu.memory_space<vmem>>, %arg4: memref<128x128xbf16, #tpu.memory_space<vmem>>) attributes {dimension_semantics = [#tpu.dimension_semantics<parallel>], iteration_bounds = array<i64: 1>, scalar_prefetch = 0 : i64, scratch_operands = 0 : i64, tpu.core_type = #tpu.core_type<tc>, window_params = [{transform_indices = @transform_0, window_bounds = array<i64: 128, 128>}, {pipeline_mode = #tpu.pipeline_mode<synchronous>, transform_indices = @transform_1, window_bounds = array<i64: 1, 128>}, {pipeline_mode = #tpu.pipeline_mode<synchronous>, transform_indices = @transform_2, window_bounds = array<i64: 1, 128>}, {transform_indices = @transform_3, window_bounds = array<i64: 128, 128>}]} {
    %c0 = arith.constant 0 : index
    %c0_0 = arith.constant 0 : index
    %0 = vector.load %arg1[%c0, %c0_0] : memref<128x128xf32, #tpu.memory_space<vmem>>, vector<128x128xf32>
    %c0_1 = arith.constant 0 : index
    %c0_2 = arith.constant 0 : index
    %1 = vector.load %arg2[%c0_1, %c0_2] : memref<1x128xf32, #tpu.memory_space<vmem>>, vector<1x128xf32>
    %2 = vector.broadcast %1 : vector<1x128xf32> to vector<128x128xf32>
    %3 = arith.mulf %0, %2 : vector<128x128xf32>
    %c0_3 = arith.constant 0 : index
    %c0_4 = arith.constant 0 : index
    %4 = vector.load %arg3[%c0_3, %c0_4] : memref<1x128xf32, #tpu.memory_space<vmem>>, vector<1x128xf32>
    %5 = vector.broadcast %4 : vector<1x128xf32> to vector<128x128xf32>
    %6 = arith.addf %3, %5 : vector<128x128xf32>
    %cst = arith.constant 0.000000e+00 : f32
    %7 = vector.broadcast %cst : f32 to vector<128x128xf32>
    %8 = arith.cmpf oge, %6, %7 : vector<128x128xf32>
    %cst_5 = arith.constant 2.000000e-01 : f32
    %9 = vector.broadcast %cst_5 : f32 to vector<128x128xf32>
    %10 = arith.mulf %9, %6 : vector<128x128xf32>
    %11 = arith.select %8, %6, %10 : vector<128x128xi1>, vector<128x128xf32>
    %12 = arith.truncf %11 : vector<128x128xf32> to vector<128x128xbf16>
    %c0_6 = arith.constant 0 : index
    %c0_7 = arith.constant 0 : index
    %13 = vector.load %arg4[%c0_6, %c0_7] : memref<128x128xbf16, #tpu.memory_space<vmem>>, vector<128x128xbf16>
    tpu.vector_store %arg4[%c0_6, %c0_7], %12 {strides = array<i32>} : memref<128x128xbf16, #tpu.memory_space<vmem>>, vector<128x128xbf16>,
    return
  }
  func.func @transform_0(%arg0: i32) -> (i32, i32) {
    %c0_i32 = arith.constant 0 : i32
    %c0_i32_0 = arith.constant 0 : i32
    return %arg0, %c0_i32 : i32, i32
  }
  func.func @transform_1(%arg0: i32) -> (i32, i32) {
    %c0_i32 = arith.constant 0 : i32
    %c0_i32_0 = arith.constant 0 : i32
    %c0_i32_1 = arith.constant 0 : i32
    return %c0_i32, %c0_i32_0 : i32, i32
  }
  func.func @transform_2(%arg0: i32) -> (i32, i32) {
    %c0_i32 = arith.constant 0 : i32
    %c0_i32_0 = arith.constant 0 : i32
    %c0_i32_1 = arith.constant 0 : i32
    return %c0_i32, %c0_i32_0 : i32, i32
  }
  func.func @transform_3(%arg0: i32) -> (i32, i32) {
    %c0_i32 = arith.constant 0 : i32
    %c0_i32_0 = arith.constant 0 : i32
    return %arg0, %c0_i32 : i32, i32
  }
}

module attributes {stable_mosaic.version = 11 : i64} {
  func.func @_bn_lrelu_kernel(%arg0: i32, %arg1: memref<32x128xf32, #tpu.memory_space<vmem>>, %arg2: memref<1x128xf32, #tpu.memory_space<vmem>>, %arg3: memref<1x128xf32, #tpu.memory_space<vmem>>, %arg4: memref<32x128xbf16, #tpu.memory_space<vmem>>) attributes {dimension_semantics = [#tpu.dimension_semantics<parallel>], iteration_bounds = array<i64: 1>, scalar_prefetch = 0 : i64, scratch_operands = 0 : i64, tpu.core_type = #tpu.core_type<tc>, window_params = [{transform_indices = @transform_0, window_bounds = array<i64: 32, 128>}, {pipeline_mode = #tpu.pipeline_mode<synchronous>, transform_indices = @transform_1, window_bounds = array<i64: 1, 128>}, {pipeline_mode = #tpu.pipeline_mode<synchronous>, transform_indices = @transform_2, window_bounds = array<i64: 1, 128>}, {transform_indices = @transform_3, window_bounds = array<i64: 32, 128>}]} {
    %c0 = arith.constant 0 : index
    %c0_0 = arith.constant 0 : index
    %0 = vector.load %arg1[%c0, %c0_0] : memref<32x128xf32, #tpu.memory_space<vmem>>, vector<32x128xf32>
    %c0_1 = arith.constant 0 : index
    %c0_2 = arith.constant 0 : index
    %1 = vector.load %arg2[%c0_1, %c0_2] : memref<1x128xf32, #tpu.memory_space<vmem>>, vector<1x128xf32>
    %2 = vector.broadcast %1 : vector<1x128xf32> to vector<32x128xf32>
    %3 = arith.mulf %0, %2 : vector<32x128xf32>
    %c0_3 = arith.constant 0 : index
    %c0_4 = arith.constant 0 : index
    %4 = vector.load %arg3[%c0_3, %c0_4] : memref<1x128xf32, #tpu.memory_space<vmem>>, vector<1x128xf32>
    %5 = vector.broadcast %4 : vector<1x128xf32> to vector<32x128xf32>
    %6 = arith.addf %3, %5 : vector<32x128xf32>
    %cst = arith.constant 0.000000e+00 : f32
    %7 = vector.broadcast %cst : f32 to vector<32x128xf32>
    %8 = arith.cmpf oge, %6, %7 : vector<32x128xf32>
    %cst_5 = arith.constant 2.000000e-01 : f32
    %9 = vector.broadcast %cst_5 : f32 to vector<32x128xf32>
    %10 = arith.mulf %9, %6 : vector<32x128xf32>
    %11 = arith.select %8, %6, %10 : vector<32x128xi1>, vector<32x128xf32>
    %12 = arith.truncf %11 : vector<32x128xf32> to vector<32x128xbf16>
    %c0_6 = arith.constant 0 : index
    %c0_7 = arith.constant 0 : index
    %13 = vector.load %arg4[%c0_6, %c0_7] : memref<32x128xbf16, #tpu.memory_space<vmem>>, vector<32x128xbf16>
    tpu.vector_store %arg4[%c0_6, %c0_7], %12 {strides = array<i32>} : memref<32x128xbf16, #tpu.memory_space<vmem>>, vector<32x128xbf16>,
    return
  }
  func.func @transform_0(%arg0: i32) -> (i32, i32) {
    %c0_i32 = arith.constant 0 : i32
    %c0_i32_0 = arith.constant 0 : i32
    return %arg0, %c0_i32 : i32, i32
  }
  func.func @transform_1(%arg0: i32) -> (i32, i32) {
    %c0_i32 = arith.constant 0 : i32
    %c0_i32_0 = arith.constant 0 : i32
    %c0_i32_1 = arith.constant 0 : i32
    return %c0_i32, %c0_i32_0 : i32, i32
  }
  func.func @transform_2(%arg0: i32) -> (i32, i32) {
    %c0_i32 = arith.constant 0 : i32
    %c0_i32_0 = arith.constant 0 : i32
    %c0_i32_1 = arith.constant 0 : i32
    return %c0_i32, %c0_i32_0 : i32, i32
  }
  func.func @transform_3(%arg0: i32) -> (i32, i32) {
    %c0_i32 = arith.constant 0 : i32
    %c0_i32_0 = arith.constant 0 : i32
    return %arg0, %c0_i32 : i32, i32
  }
}

module attributes {stable_mosaic.version = 11 : i64} {
  func.func @_conv_gemm_kernel(%arg0: i32, %arg1: i32, %arg2: memref<32x512xbf16, #tpu.memory_space<vmem>>, %arg3: memref<512x128xbf16, #tpu.memory_space<vmem>>, %arg4: memref<32x128xf32, #tpu.memory_space<vmem>>, %arg5: memref<1x128xf32, #tpu.memory_space<vmem>>, %arg6: memref<1x128xf32, #tpu.memory_space<vmem>>, %arg7: memref<32x128xf32, #tpu.memory_space<vmem>>) attributes {dimension_semantics = [#tpu.dimension_semantics<arbitrary>, #tpu.dimension_semantics<arbitrary>], iteration_bounds = array<i64: 1, 2>, scalar_prefetch = 0 : i64, scratch_operands = 1 : i64, tpu.core_type = #tpu.core_type<tc>, window_params = [{transform_indices = @transform_0, window_bounds = array<i64: 32, 512>}, {transform_indices = @transform_1, window_bounds = array<i64: 512, 128>}, {transform_indices = @transform_2, window_bounds = array<i64: 32, 128>}, {pipeline_mode = #tpu.pipeline_mode<synchronous>, transform_indices = @transform_3, window_bounds = array<i64: 1, 128>}, {pipeline_mode = #tpu.pipeline_mode<synchronous>, transform_indices = @transform_4, window_bounds = array<i64: 1, 128>}]} {
    %c0_i32 = arith.constant 0 : i32
    %0 = arith.cmpi eq, %arg1, %c0_i32 : i32
    %1 = arith.extui %0 : i1 to i32
    %c0_i32_0 = arith.constant 0 : i32
    %2 = arith.cmpi ne, %1, %c0_i32_0 : i32
    scf.if %2 {
      %cst_12 = arith.constant 0.000000e+00 : f32
      %17 = vector.broadcast %cst_12 : f32 to vector<32x128xf32>
      %c0_13 = arith.constant 0 : index
      %c0_14 = arith.constant 0 : index
      %18 = vector.load %arg7[%c0_13, %c0_14] : memref<32x128xf32, #tpu.memory_space<vmem>>, vector<32x128xf32>
      tpu.vector_store %arg7[%c0_13, %c0_14], %17 {strides = array<i32>} : memref<32x128xf32, #tpu.memory_space<vmem>>, vector<32x128xf32>,
    } else {
    }
    %c0 = arith.constant 0 : index
    %c0_1 = arith.constant 0 : index
    %3 = vector.load %arg7[%c0, %c0_1] : memref<32x128xf32, #tpu.memory_space<vmem>>, vector<32x128xf32>
    %c0_2 = arith.constant 0 : index
    %c0_3 = arith.constant 0 : index
    %4 = vector.load %arg2[%c0_2, %c0_3] : memref<32x512xbf16, #tpu.memory_space<vmem>>, vector<32x512xbf16>
    %c0_4 = arith.constant 0 : index
    %c0_5 = arith.constant 0 : index
    %5 = vector.load %arg3[%c0_4, %c0_5] : memref<512x128xbf16, #tpu.memory_space<vmem>>, vector<512x128xbf16>
    %cst = arith.constant dense<0.000000e+00> : vector<32x128xf32>
    %6 = tpu.matmul %4, %5, %cst {dimension_numbers = #tpu.dot_dimension_numbers<[1], [0], [0], [1], [0, 0, 1, 1], [], []>} : vector<32x512xbf16>, vector<512x128xbf16>, vector<32x128xf32> -> vector<32x128xf32>
    %7 = arith.addf %3, %6 : vector<32x128xf32>
    %c0_6 = arith.constant 0 : index
    %c0_7 = arith.constant 0 : index
    %8 = vector.load %arg7[%c0_6, %c0_7] : memref<32x128xf32, #tpu.memory_space<vmem>>, vector<32x128xf32>
    tpu.vector_store %arg7[%c0_6, %c0_7], %7 {strides = array<i32>} : memref<32x128xf32, #tpu.memory_space<vmem>>, vector<32x128xf32>,
    %c0_i32_8 = arith.constant 0 : i32
    %9 = arith.cmpi eq, %arg0, %c0_i32_8 : i32
    %c0_i32_9 = arith.constant 0 : i32
    %10 = arith.cmpi eq, %arg1, %c0_i32_9 : i32
    %11 = arith.andi %9, %10 : i1
    %12 = arith.extui %11 : i1 to i32
    %c0_i32_10 = arith.constant 0 : i32
    %13 = arith.cmpi ne, %12, %c0_i32_10 : i32
    scf.if %13 {
      %cst_12 = arith.constant 0.000000e+00 : f32
      %17 = vector.broadcast %cst_12 : f32 to vector<1x128xf32>
      %c0_13 = arith.constant 0 : index
      %c0_14 = arith.constant 0 : index
      %18 = vector.load %arg5[%c0_13, %c0_14] : memref<1x128xf32, #tpu.memory_space<vmem>>, vector<1x128xf32>
      tpu.vector_store %arg5[%c0_13, %c0_14], %17 {strides = array<i32>} : memref<1x128xf32, #tpu.memory_space<vmem>>, vector<1x128xf32>,
      %cst_15 = arith.constant 0.000000e+00 : f32
      %19 = vector.broadcast %cst_15 : f32 to vector<1x128xf32>
      %c0_16 = arith.constant 0 : index
      %c0_17 = arith.constant 0 : index
      %20 = vector.load %arg6[%c0_16, %c0_17] : memref<1x128xf32, #tpu.memory_space<vmem>>, vector<1x128xf32>
      tpu.vector_store %arg6[%c0_16, %c0_17], %19 {strides = array<i32>} : memref<1x128xf32, #tpu.memory_space<vmem>>, vector<1x128xf32>,
    } else {
    }
    %c1_i32 = arith.constant 1 : i32
    %14 = arith.cmpi eq, %arg1, %c1_i32 : i32
    %15 = arith.extui %14 : i1 to i32
    %c0_i32_11 = arith.constant 0 : i32
    %16 = arith.cmpi ne, %15, %c0_i32_11 : i32
    scf.if %16 {
      %c0_12 = arith.constant 0 : index
      %c0_13 = arith.constant 0 : index
      %17 = vector.load %arg7[%c0_12, %c0_13] : memref<32x128xf32, #tpu.memory_space<vmem>>, vector<32x128xf32>
      %c0_14 = arith.constant 0 : index
      %c0_15 = arith.constant 0 : index
      %18 = vector.load %arg4[%c0_14, %c0_15] : memref<32x128xf32, #tpu.memory_space<vmem>>, vector<32x128xf32>
      tpu.vector_store %arg4[%c0_14, %c0_15], %17 {strides = array<i32>} : memref<32x128xf32, #tpu.memory_space<vmem>>, vector<32x128xf32>,
      %c0_16 = arith.constant 0 : index
      %c0_17 = arith.constant 0 : index
      %19 = vector.load %arg5[%c0_16, %c0_17] : memref<1x128xf32, #tpu.memory_space<vmem>>, vector<1x128xf32>
      %cst_18 = arith.constant dense<0.000000e+00> : vector<128xf32>
      %20 = vector.multi_reduction <add>, %17, %cst_18 [0] : vector<32x128xf32> to vector<128xf32>
      %21 = vector.shape_cast %20 : vector<128xf32> to vector<1x128xf32>
      %22 = arith.addf %19, %21 : vector<1x128xf32>
      %c0_19 = arith.constant 0 : index
      %c0_20 = arith.constant 0 : index
      %23 = vector.load %arg5[%c0_19, %c0_20] : memref<1x128xf32, #tpu.memory_space<vmem>>, vector<1x128xf32>
      tpu.vector_store %arg5[%c0_19, %c0_20], %22 {strides = array<i32>} : memref<1x128xf32, #tpu.memory_space<vmem>>, vector<1x128xf32>,
      %c0_21 = arith.constant 0 : index
      %c0_22 = arith.constant 0 : index
      %24 = vector.load %arg6[%c0_21, %c0_22] : memref<1x128xf32, #tpu.memory_space<vmem>>, vector<1x128xf32>
      %25 = arith.mulf %17, %17 : vector<32x128xf32>
      %cst_23 = arith.constant dense<0.000000e+00> : vector<128xf32>
      %26 = vector.multi_reduction <add>, %25, %cst_23 [0] : vector<32x128xf32> to vector<128xf32>
      %27 = vector.shape_cast %26 : vector<128xf32> to vector<1x128xf32>
      %28 = arith.addf %24, %27 : vector<1x128xf32>
      %c0_24 = arith.constant 0 : index
      %c0_25 = arith.constant 0 : index
      %29 = vector.load %arg6[%c0_24, %c0_25] : memref<1x128xf32, #tpu.memory_space<vmem>>, vector<1x128xf32>
      tpu.vector_store %arg6[%c0_24, %c0_25], %28 {strides = array<i32>} : memref<1x128xf32, #tpu.memory_space<vmem>>, vector<1x128xf32>,
    } else {
    }
    return
  }
  func.func @transform_0(%arg0: i32, %arg1: i32) -> (i32, i32) {
    %c0_i32 = arith.constant 0 : i32
    return %arg0, %arg1 : i32, i32
  }
  func.func @transform_1(%arg0: i32, %arg1: i32) -> (i32, i32) {
    %c0_i32 = arith.constant 0 : i32
    %c0_i32_0 = arith.constant 0 : i32
    return %arg1, %c0_i32 : i32, i32
  }
  func.func @transform_2(%arg0: i32, %arg1: i32) -> (i32, i32) {
    %c0_i32 = arith.constant 0 : i32
    %c0_i32_0 = arith.constant 0 : i32
    return %arg0, %c0_i32 : i32, i32
  }
  func.func @transform_3(%arg0: i32, %arg1: i32) -> (i32, i32) {
    %c0_i32 = arith.constant 0 : i32
    %c0_i32_0 = arith.constant 0 : i32
    %c0_i32_1 = arith.constant 0 : i32
    return %c0_i32, %c0_i32_0 : i32, i32
  }
  func.func @transform_4(%arg0: i32, %arg1: i32) -> (i32, i32) {
    %c0_i32 = arith.constant 0 : i32
    %c0_i32_0 = arith.constant 0 : i32
    %c0_i32_1 = arith.constant 0 : i32
    return %c0_i32, %c0_i32_0 : i32, i32
  }
}

module attributes {stable_mosaic.version = 11 : i64} {
  func.func @_conv_gemm_kernel(%arg0: i32, %arg1: i32, %arg2: memref<32x512xbf16, #tpu.memory_space<vmem>>, %arg3: memref<512x128xbf16, #tpu.memory_space<vmem>>, %arg4: memref<32x128xf32, #tpu.memory_space<vmem>>, %arg5: memref<1x128xf32, #tpu.memory_space<vmem>>, %arg6: memref<1x128xf32, #tpu.memory_space<vmem>>, %arg7: memref<32x128xf32, #tpu.memory_space<vmem>>) attributes {dimension_semantics = [#tpu.dimension_semantics<arbitrary>, #tpu.dimension_semantics<arbitrary>], iteration_bounds = array<i64: 1, 1>, scalar_prefetch = 0 : i64, scratch_operands = 1 : i64, tpu.core_type = #tpu.core_type<tc>, window_params = [{transform_indices = @transform_0, window_bounds = array<i64: 32, 512>}, {transform_indices = @transform_1, window_bounds = array<i64: 512, 128>}, {transform_indices = @transform_2, window_bounds = array<i64: 32, 128>}, {pipeline_mode = #tpu.pipeline_mode<synchronous>, transform_indices = @transform_3, window_bounds = array<i64: 1, 128>}, {pipeline_mode = #tpu.pipeline_mode<synchronous>, transform_indices = @transform_4, window_bounds = array<i64: 1, 128>}]} {
    %c0_i32 = arith.constant 0 : i32
    %0 = arith.cmpi eq, %arg1, %c0_i32 : i32
    %1 = arith.extui %0 : i1 to i32
    %c0_i32_0 = arith.constant 0 : i32
    %2 = arith.cmpi ne, %1, %c0_i32_0 : i32
    scf.if %2 {
      %cst_13 = arith.constant 0.000000e+00 : f32
      %17 = vector.broadcast %cst_13 : f32 to vector<32x128xf32>
      %c0_14 = arith.constant 0 : index
      %c0_15 = arith.constant 0 : index
      %18 = vector.load %arg7[%c0_14, %c0_15] : memref<32x128xf32, #tpu.memory_space<vmem>>, vector<32x128xf32>
      tpu.vector_store %arg7[%c0_14, %c0_15], %17 {strides = array<i32>} : memref<32x128xf32, #tpu.memory_space<vmem>>, vector<32x128xf32>,
    } else {
    }
    %c0 = arith.constant 0 : index
    %c0_1 = arith.constant 0 : index
    %3 = vector.load %arg7[%c0, %c0_1] : memref<32x128xf32, #tpu.memory_space<vmem>>, vector<32x128xf32>
    %c0_2 = arith.constant 0 : index
    %c0_3 = arith.constant 0 : index
    %4 = vector.load %arg2[%c0_2, %c0_3] : memref<32x512xbf16, #tpu.memory_space<vmem>>, vector<32x512xbf16>
    %c0_4 = arith.constant 0 : index
    %c0_5 = arith.constant 0 : index
    %5 = vector.load %arg3[%c0_4, %c0_5] : memref<512x128xbf16, #tpu.memory_space<vmem>>, vector<512x128xbf16>
    %cst = arith.constant dense<0.000000e+00> : vector<32x128xf32>
    %6 = tpu.matmul %4, %5, %cst {dimension_numbers = #tpu.dot_dimension_numbers<[1], [0], [0], [1], [0, 0, 1, 1], [], []>} : vector<32x512xbf16>, vector<512x128xbf16>, vector<32x128xf32> -> vector<32x128xf32>
    %7 = arith.addf %3, %6 : vector<32x128xf32>
    %c0_6 = arith.constant 0 : index
    %c0_7 = arith.constant 0 : index
    %8 = vector.load %arg7[%c0_6, %c0_7] : memref<32x128xf32, #tpu.memory_space<vmem>>, vector<32x128xf32>
    tpu.vector_store %arg7[%c0_6, %c0_7], %7 {strides = array<i32>} : memref<32x128xf32, #tpu.memory_space<vmem>>, vector<32x128xf32>,
    %c0_i32_8 = arith.constant 0 : i32
    %9 = arith.cmpi eq, %arg0, %c0_i32_8 : i32
    %c0_i32_9 = arith.constant 0 : i32
    %10 = arith.cmpi eq, %arg1, %c0_i32_9 : i32
    %11 = arith.andi %9, %10 : i1
    %12 = arith.extui %11 : i1 to i32
    %c0_i32_10 = arith.constant 0 : i32
    %13 = arith.cmpi ne, %12, %c0_i32_10 : i32
    scf.if %13 {
      %cst_13 = arith.constant 0.000000e+00 : f32
      %17 = vector.broadcast %cst_13 : f32 to vector<1x128xf32>
      %c0_14 = arith.constant 0 : index
      %c0_15 = arith.constant 0 : index
      %18 = vector.load %arg5[%c0_14, %c0_15] : memref<1x128xf32, #tpu.memory_space<vmem>>, vector<1x128xf32>
      tpu.vector_store %arg5[%c0_14, %c0_15], %17 {strides = array<i32>} : memref<1x128xf32, #tpu.memory_space<vmem>>, vector<1x128xf32>,
      %cst_16 = arith.constant 0.000000e+00 : f32
      %19 = vector.broadcast %cst_16 : f32 to vector<1x128xf32>
      %c0_17 = arith.constant 0 : index
      %c0_18 = arith.constant 0 : index
      %20 = vector.load %arg6[%c0_17, %c0_18] : memref<1x128xf32, #tpu.memory_space<vmem>>, vector<1x128xf32>
      tpu.vector_store %arg6[%c0_17, %c0_18], %19 {strides = array<i32>} : memref<1x128xf32, #tpu.memory_space<vmem>>, vector<1x128xf32>,
    } else {
    }
    %c0_i32_11 = arith.constant 0 : i32
    %14 = arith.cmpi eq, %arg1, %c0_i32_11 : i32
    %15 = arith.extui %14 : i1 to i32
    %c0_i32_12 = arith.constant 0 : i32
    %16 = arith.cmpi ne, %15, %c0_i32_12 : i32
    scf.if %16 {
      %c0_13 = arith.constant 0 : index
      %c0_14 = arith.constant 0 : index
      %17 = vector.load %arg7[%c0_13, %c0_14] : memref<32x128xf32, #tpu.memory_space<vmem>>, vector<32x128xf32>
      %c0_15 = arith.constant 0 : index
      %c0_16 = arith.constant 0 : index
      %18 = vector.load %arg4[%c0_15, %c0_16] : memref<32x128xf32, #tpu.memory_space<vmem>>, vector<32x128xf32>
      tpu.vector_store %arg4[%c0_15, %c0_16], %17 {strides = array<i32>} : memref<32x128xf32, #tpu.memory_space<vmem>>, vector<32x128xf32>,
      %c0_17 = arith.constant 0 : index
      %c0_18 = arith.constant 0 : index
      %19 = vector.load %arg5[%c0_17, %c0_18] : memref<1x128xf32, #tpu.memory_space<vmem>>, vector<1x128xf32>
      %cst_19 = arith.constant dense<0.000000e+00> : vector<128xf32>
      %20 = vector.multi_reduction <add>, %17, %cst_19 [0] : vector<32x128xf32> to vector<128xf32>
      %21 = vector.shape_cast %20 : vector<128xf32> to vector<1x128xf32>
      %22 = arith.addf %19, %21 : vector<1x128xf32>
      %c0_20 = arith.constant 0 : index
      %c0_21 = arith.constant 0 : index
      %23 = vector.load %arg5[%c0_20, %c0_21] : memref<1x128xf32, #tpu.memory_space<vmem>>, vector<1x128xf32>
      tpu.vector_store %arg5[%c0_20, %c0_21], %22 {strides = array<i32>} : memref<1x128xf32, #tpu.memory_space<vmem>>, vector<1x128xf32>,
      %c0_22 = arith.constant 0 : index
      %c0_23 = arith.constant 0 : index
      %24 = vector.load %arg6[%c0_22, %c0_23] : memref<1x128xf32, #tpu.memory_space<vmem>>, vector<1x128xf32>
      %25 = arith.mulf %17, %17 : vector<32x128xf32>
      %cst_24 = arith.constant dense<0.000000e+00> : vector<128xf32>
      %26 = vector.multi_reduction <add>, %25, %cst_24 [0] : vector<32x128xf32> to vector<128xf32>
      %27 = vector.shape_cast %26 : vector<128xf32> to vector<1x128xf32>
      %28 = arith.addf %24, %27 : vector<1x128xf32>
      %c0_25 = arith.constant 0 : index
      %c0_26 = arith.constant 0 : index
      %29 = vector.load %arg6[%c0_25, %c0_26] : memref<1x128xf32, #tpu.memory_space<vmem>>, vector<1x128xf32>
      tpu.vector_store %arg6[%c0_25, %c0_26], %28 {strides = array<i32>} : memref<1x128xf32, #tpu.memory_space<vmem>>, vector<1x128xf32>,
    } else {
    }
    return
  }
  func.func @transform_0(%arg0: i32, %arg1: i32) -> (i32, i32) {
    %c0_i32 = arith.constant 0 : i32
    return %arg0, %arg1 : i32, i32
  }
  func.func @transform_1(%arg0: i32, %arg1: i32) -> (i32, i32) {
    %c0_i32 = arith.constant 0 : i32
    %c0_i32_0 = arith.constant 0 : i32
    return %arg1, %c0_i32 : i32, i32
  }
  func.func @transform_2(%arg0: i32, %arg1: i32) -> (i32, i32) {
    %c0_i32 = arith.constant 0 : i32
    %c0_i32_0 = arith.constant 0 : i32
    return %arg0, %c0_i32 : i32, i32
  }
  func.func @transform_3(%arg0: i32, %arg1: i32) -> (i32, i32) {
    %c0_i32 = arith.constant 0 : i32
    %c0_i32_0 = arith.constant 0 : i32
    %c0_i32_1 = arith.constant 0 : i32
    return %c0_i32, %c0_i32_0 : i32, i32
  }
  func.func @transform_4(%arg0: i32, %arg1: i32) -> (i32, i32) {
    %c0_i32 = arith.constant 0 : i32
    %c0_i32_0 = arith.constant 0 : i32
    %c0_i32_1 = arith.constant 0 : i32
    return %c0_i32, %c0_i32_0 : i32, i32
  }
}

module attributes {stable_mosaic.version = 11 : i64} {
  func.func @_conv_gemm_kernel(%arg0: i32, %arg1: i32, %arg2: memref<16x512xbf16, #tpu.memory_space<vmem>>, %arg3: memref<512x128xbf16, #tpu.memory_space<vmem>>, %arg4: memref<1x128xf32, #tpu.memory_space<vmem>>, %arg5: memref<16x128xf32, #tpu.memory_space<vmem>>, %arg6: memref<16x128xf32, #tpu.memory_space<vmem>>) attributes {dimension_semantics = [#tpu.dimension_semantics<parallel>, #tpu.dimension_semantics<arbitrary>], iteration_bounds = array<i64: 1, 4>, scalar_prefetch = 0 : i64, scratch_operands = 1 : i64, tpu.core_type = #tpu.core_type<tc>, window_params = [{transform_indices = @transform_0, window_bounds = array<i64: 16, 512>}, {transform_indices = @transform_1, window_bounds = array<i64: 512, 128>}, {pipeline_mode = #tpu.pipeline_mode<synchronous>, transform_indices = @transform_2, window_bounds = array<i64: 1, 128>}, {transform_indices = @transform_3, window_bounds = array<i64: 16, 128>}]} {
    %c0_i32 = arith.constant 0 : i32
    %0 = arith.cmpi eq, %arg1, %c0_i32 : i32
    %1 = arith.extui %0 : i1 to i32
    %c0_i32_0 = arith.constant 0 : i32
    %2 = arith.cmpi ne, %1, %c0_i32_0 : i32
    scf.if %2 {
      %cst_9 = arith.constant 0.000000e+00 : f32
      %12 = vector.broadcast %cst_9 : f32 to vector<16x128xf32>
      %c0_10 = arith.constant 0 : index
      %c0_11 = arith.constant 0 : index
      %13 = vector.load %arg6[%c0_10, %c0_11] : memref<16x128xf32, #tpu.memory_space<vmem>>, vector<16x128xf32>
      tpu.vector_store %arg6[%c0_10, %c0_11], %12 {strides = array<i32>} : memref<16x128xf32, #tpu.memory_space<vmem>>, vector<16x128xf32>,
    } else {
    }
    %c0 = arith.constant 0 : index
    %c0_1 = arith.constant 0 : index
    %3 = vector.load %arg6[%c0, %c0_1] : memref<16x128xf32, #tpu.memory_space<vmem>>, vector<16x128xf32>
    %c0_2 = arith.constant 0 : index
    %c0_3 = arith.constant 0 : index
    %4 = vector.load %arg2[%c0_2, %c0_3] : memref<16x512xbf16, #tpu.memory_space<vmem>>, vector<16x512xbf16>
    %c0_4 = arith.constant 0 : index
    %c0_5 = arith.constant 0 : index
    %5 = vector.load %arg3[%c0_4, %c0_5] : memref<512x128xbf16, #tpu.memory_space<vmem>>, vector<512x128xbf16>
    %cst = arith.constant dense<0.000000e+00> : vector<16x128xf32>
    %6 = tpu.matmul %4, %5, %cst {dimension_numbers = #tpu.dot_dimension_numbers<[1], [0], [0], [1], [0, 0, 1, 1], [], []>} : vector<16x512xbf16>, vector<512x128xbf16>, vector<16x128xf32> -> vector<16x128xf32>
    %7 = arith.addf %3, %6 : vector<16x128xf32>
    %c0_6 = arith.constant 0 : index
    %c0_7 = arith.constant 0 : index
    %8 = vector.load %arg6[%c0_6, %c0_7] : memref<16x128xf32, #tpu.memory_space<vmem>>, vector<16x128xf32>
    tpu.vector_store %arg6[%c0_6, %c0_7], %7 {strides = array<i32>} : memref<16x128xf32, #tpu.memory_space<vmem>>, vector<16x128xf32>,
    %c3_i32 = arith.constant 3 : i32
    %9 = arith.cmpi eq, %arg1, %c3_i32 : i32
    %10 = arith.extui %9 : i1 to i32
    %c0_i32_8 = arith.constant 0 : i32
    %11 = arith.cmpi ne, %10, %c0_i32_8 : i32
    scf.if %11 {
      %c0_9 = arith.constant 0 : index
      %c0_10 = arith.constant 0 : index
      %12 = vector.load %arg6[%c0_9, %c0_10] : memref<16x128xf32, #tpu.memory_space<vmem>>, vector<16x128xf32>
      %c0_11 = arith.constant 0 : index
      %c0_12 = arith.constant 0 : index
      %13 = vector.load %arg4[%c0_11, %c0_12] : memref<1x128xf32, #tpu.memory_space<vmem>>, vector<1x128xf32>
      %14 = vector.broadcast %13 : vector<1x128xf32> to vector<16x128xf32>
      %15 = arith.addf %12, %14 : vector<16x128xf32>
      %c0_13 = arith.constant 0 : index
      %c0_14 = arith.constant 0 : index
      %16 = vector.load %arg5[%c0_13, %c0_14] : memref<16x128xf32, #tpu.memory_space<vmem>>, vector<16x128xf32>
      tpu.vector_store %arg5[%c0_13, %c0_14], %15 {strides = array<i32>} : memref<16x128xf32, #tpu.memory_space<vmem>>, vector<16x128xf32>,
    } else {
    }
    return
  }
  func.func @transform_0(%arg0: i32, %arg1: i32) -> (i32, i32) {
    %c0_i32 = arith.constant 0 : i32
    return %arg0, %arg1 : i32, i32
  }
  func.func @transform_1(%arg0: i32, %arg1: i32) -> (i32, i32) {
    %c0_i32 = arith.constant 0 : i32
    %c0_i32_0 = arith.constant 0 : i32
    return %arg1, %c0_i32 : i32, i32
  }
  func.func @transform_2(%arg0: i32, %arg1: i32) -> (i32, i32) {
    %c0_i32 = arith.constant 0 : i32
    %c0_i32_0 = arith.constant 0 : i32
    %c0_i32_1 = arith.constant 0 : i32
    return %c0_i32, %c0_i32_0 : i32, i32
  }
  func.func @transform_3(%arg0: i32, %arg1: i32) -> (i32, i32) {
    %c0_i32 = arith.constant 0 : i32
    %c0_i32_0 = arith.constant 0 : i32
    return %arg0, %c0_i32 : i32, i32
  }
}

</mosaic_0001>

<bundles_post_ra>
// kernel: _lambda_.8
= control target key start
LH: loop header
LB: loop body
LE: loop exit
PB: predicated region body
PF: predicated region fallthrough
CT: control target
= control target key end

     0   :  { %s1494_s12 = smov 0   ;;  %s1496_s13 = smov 0   ;;  %s1637_s0 = inlined_call_operand.vmem [shape: bf16[512,128], index: 0, kind: input, shape index: {}]   ;;  %s1638_s1 = inlined_call_operand.vmem [shape: bf16[128,128], index: 1, kind: input, shape index: {}]   ;;  %s1639_s2 = inlined_call_operand.vmem [shape: f32[1,128], index: 2, kind: input, shape index: {}]   ;;  %s1640_s3 = inlined_call_operand.vmem [shape: bf16[512,128], index: 3, kind: output, shape index: {}]  }
   0x1   :  { %s1498_s14 = smov 0  }
   0x2 LB: > { %s25_s15 = sadd.s32 1, %s1468_s13  ;;  %p1123_p0 = scmp.ge.s32.totalorder %s1472_s14, 1  ;;  %s1472_s14 = sphi %s1498_s14, %s13_s14   ;;  %s1468_s13 = sphi %s1496_s13, %s1642_s13   ;;  %s1464_s12 = sphi %s1494_s12, %s1641_s12  }
   0x3   : > { %p27_p1 = scmp.ge.s32.totalorder %s25_s15, 2  ;;  %p166_p2 = scmp.lt.s32.totalorder %s1472_s14, 3 }
   0x5   : > { %s1644_s15 = smov (%p27_p1, %s25_s15), 0  ;;  %p167_p3 = pnand %p1123_p0, %p166_p2 }
   0x6   : > { %v1426_v0 = vld [vmem:[%s1638_s1] sm:$0xff] (!%p167_p3)   ;;  %s1124_s18 = sshll.u32 (!%p167_p3), %s1464_s12, 5  ;;  %v1427_v1 = vld [vmem:[%s1638_s1 + $0x8] sm:$0xff] (!%p167_p3)   ;;  %v1428_v2 = vld [vmem:[%s1638_s1 + $0x10] sm:$0xff] (!%p167_p3)  }
   0x7   : > { %170 = sbr.rel (%p167_p3) target bundleno = 294 (0x126), region = 32  ;;  %p199_p4 = scmp.lt.s32.totalorder (!%p167_p3), %s1124_s18, 63  ;;  %1338 = vmatprep.subr.bf16.mxu0 (!%p167_p3), %v1426_v0  ;;  %1386 = vmatprep.subr.bf16.mxu1 (!%p167_p3), %v1426_v0  ;;  %v1429_v3 = vld [vmem:[%s1638_s1 + $0x18] sm:$0xff] (!%p167_p3)   ;;  %v1430_v6 = vld [vmem:[%s1638_s1 + $0x20] sm:$0xff] (!%p167_p3)   ;;  %v1431_v7 = vld [vmem:[%s1638_s1 + $0x28] sm:$0xff] (!%p167_p3)  }
   0x8   : > { %1339 = vmatpush3.bf16.msra.mxu0 (!%p167_p3), %v1426_v0  ;;  %1394 = vmatpush3.bf16.msra.mxu1 (!%p167_p3), %v1426_v0  ;;  %v1432_v8 = vld [vmem:[%s1638_s1 + $0x30] sm:$0xff] (!%p167_p3)   ;;  %v1433_v9 = vld [vmem:[%s1638_s1 + $0x38] sm:$0xff] (!%p167_p3)   ;;  %v1565_v24 = vld [vmem:[%s1639_s2] ss:$0 sm:$0xff] (!%p167_p3) }
   0x9   : > { %1340 = vmatprep.subr.bf16.mxu0 (!%p167_p3), %v1427_v1  ;;  %1387 = vmatprep.subr.bf16.mxu1 (!%p167_p3), %v1427_v1 }
   0xc   : > { %1341 = vmatpush3.bf16.msra.mxu0 (!%p167_p3), %v1427_v1  ;;  %1395 = vmatpush3.bf16.msra.mxu1 (!%p167_p3), %v1427_v1 }
   0xd   : > { %1342 = vmatprep.subr.bf16.mxu0 (!%p167_p3), %v1428_v2  ;;  %1388 = vmatprep.subr.bf16.mxu1 (!%p167_p3), %v1428_v2 }
   0xe   : > { %s1646_s18 = smov (!%p199_p4, %s1124_s18), 63 }
   0xf   : > { %s1125_s23 = sshll.u32 %s1646_s18, 2 }
  0x10   : > { %s1529_s26 = scalar_lea.vmem %s1637_s0, %s1125_s23  ;;  %1343 = vmatpush3.bf16.msra.mxu0 %v1428_v2  ;;  %1396 = vmatpush3.bf16.msra.mxu1 %v1428_v2  ;;  %s1582_s17 = scalar_lea.vmem %s1640_s3, %s1125_s23 }
  0x11   : > { %v1434_v4 = vld [vmem:[%s1529_s26] sm:$0xff]   ;;  %1344 = vmatprep.subr.bf16.mxu0 %v1429_v3  ;;  %1389 = vmatprep.subr.bf16.mxu1 %v1429_v3  ;;  %v1436_v10 = vld [vmem:[%s1529_s26 + $0x8] sm:$0xff]   ;;  %v1438_v12 = vld [vmem:[%s1529_s26 + $0x10] sm:$0xff]  }
  0x12   : > { %v1435_v5 = vld [vmem:[%s1529_s26 + $0x40] sm:$0xff]   ;;  %1354 = vmatprep.mubr.bf16.mxu0 %v1434_v4  ;;  %v1437_v11 = vld [vmem:[%s1529_s26 + $0x48] sm:$0xff]   ;;  %v1439_v13 = vld [vmem:[%s1529_s26 + $0x50] sm:$0xff]  }
  0x13   : > { %1370 = vmatprep.mubr.bf16.mxu1 %v1435_v5  ;;  %v1440_v14 = vld [vmem:[%s1529_s26 + $0x18] sm:$0xff]   ;;  %v1442_v16 = vld [vmem:[%s1529_s26 + $0x20] sm:$0xff]   ;;  %v1444_v18 = vld [vmem:[%s1529_s26 + $0x28] sm:$0xff]  }
  0x14   : > { %1345 = vmatpush3.bf16.msra.mxu0 %v1429_v3  ;;  %1397 = vmatpush3.bf16.msra.mxu1 %v1429_v3  ;;  %v1441_v15 = vld [vmem:[%s1529_s26 + $0x58] sm:$0xff]   ;;  %v1443_v17 = vld [vmem:[%s1529_s26 + $0x60] sm:$0xff]   ;;  %v1445_v19 = vld [vmem:[%s1529_s26 + $0x68] sm:$0xff]  }
  0x15   : > { %1346 = vmatprep.subr.bf16.mxu0 %v1430_v6  ;;  %1390 = vmatprep.subr.bf16.mxu1 %v1430_v6  ;;  %v1446_v20 = vld [vmem:[%s1529_s26 + $0x30] sm:$0xff]   ;;  %v1448_v22 = vld [vmem:[%s1529_s26 + $0x38] sm:$0xff]  }
  0x16   : > { %v1447_v21 = vld [vmem:[%s1529_s26 + $0x70] sm:$0xff]   ;;  %v1449_v23 = vld [vmem:[%s1529_s26 + $0x78] sm:$0xff]  }
  0x18   : > { %1347 = vmatpush3.bf16.msra.mxu0 %v1430_v6  ;;  %1398 = vmatpush3.bf16.msra.mxu1 %v1430_v6 }
  0x19   : > { %1348 = vmatprep.subr.bf16.mxu0 %v1431_v7  ;;  %1391 = vmatprep.subr.bf16.mxu1 %v1431_v7 }
  0x1c   : > { %1349 = vmatpush3.bf16.msra.mxu0 %v1431_v7  ;;  %1399 = vmatpush3.bf16.msra.mxu1 %v1431_v7 }
  0x1d   : > { %1350 = vmatprep.subr.bf16.mxu0 %v1432_v8  ;;  %1392 = vmatprep.subr.bf16.mxu1 %v1432_v8 }
  0x20   : > { %1351 = vmatpush3.bf16.msra.mxu0 %v1432_v8  ;;  %1400 = vmatpush3.bf16.msra.mxu1 %v1432_v8 }
  0x21   : > { %1352 = vmatprep.subr.bf16.mxu0 %v1433_v9  ;;  %1393 = vmatprep.subr.bf16.mxu1 %v1433_v9 }
  0x24   : > { %1353 = vmatpush3.bf16.msra.mxu0 %v1433_v9  ;;  %1401 = vmatpush3.bf16.msra.mxu1 %v1433_v9 }
  0x27   : > { %1355 = vmatmul.mubr.bf16.vlgmr.msra.gmra.mrb[0].mxu0 %v1436_v10  ;;  %1371 = vmatmul.mubr.bf16.vlgmr.msra.gmra.mrb[0].mxu1 %v1437_v11 }
  0x28   : > { %1358 = vmatprep.mubr.bf16.mxu0 %v1438_v12  ;;  %1374 = vmatprep.mubr.bf16.mxu1 %v1439_v13 }
  0x2f   : > { %1359 = vmatmul.mubr.bf16.gmra.mrb[4].mxu0 %v1440_v14  ;;  %1375 = vmatmul.mubr.bf16.gmra.mrb[4].mxu1 %v1441_v15 }
  0x30   : > { %1362 = vmatprep.mubr.bf16.mxu0 %v1442_v16  ;;  %1378 = vmatprep.mubr.bf16.mxu1 %v1443_v17 }
  0x37   : > { %1363 = vmatmul.mubr.bf16.gmra.mrb[8].mxu0 %v1444_v18  ;;  %1379 = vmatmul.mubr.bf16.gmra.mrb[8].mxu1 %v1445_v19 }
  0x38   : > { %1366 = vmatprep.mubr.bf16.mxu0 %v1446_v20  ;;  %1382 = vmatprep.mubr.bf16.mxu1 %v1447_v21 }
  0x3f   : > { %1367 = vmatmul.mubr.bf16.gmra.mrb[12].mxu0 %v1448_v22  ;;  %1383 = vmatmul.mubr.bf16.gmra.mrb[12].mxu1 %v1449_v23 }
  0xfa   : > { %v1356_v25 = vpop.f32.mrb[0].mxu0  ;;  %v1372_v26 = vpop.f32.mrb[0].mxu1 }
  0xfb   : > { %v749_v27 = vadd.f32 %v1356_v25, %v1565_v24  ;;  %v765_v28 = vadd.f32 %v1372_v26, %v1565_v24  ;;  %v514_v29 = vpop.f32.mrb[1].mxu0  ;;  %v578_v30 = vpop.f32.mrb[1].mxu1 }
  0xfc   : > { %v747_v31 = vadd.f32 %v1565_v24, %v514_v29  ;;  %v763_v32 = vadd.f32 %v1565_v24, %v578_v30  ;;  %v1357_v33 = vpop.f32.mrb[2].mxu0  ;;  %v1373_v34 = vpop.f32.mrb[2].mxu1 }
  0xfd   : > { %vm781_vm0 = vcmp.ge.f32.partialorder %v749_v27, 0.0  ;;  %v813_v35 = vmul.f32 0.2, %v749_v27  ;;  %vm797_vm1 = vcmp.ge.f32.partialorder %v765_v28, 0.0  ;;  %v829_v36 = vmul.f32 0.2, %v765_v28 }
  0xfe   : > { %vm779_vm2 = vcmp.ge.f32.partialorder %v747_v31, 0.0  ;;  %v811_v37 = vmul.f32 0.2, %v747_v31  ;;  %vm795_vm3 = vcmp.ge.f32.partialorder %v763_v32, 0.0  ;;  %v827_v38 = vmul.f32 0.2, %v763_v32 }
  0xff   : > { %v750_v39 = vadd.f32 %v1357_v33, %v1565_v24  ;;  %v766_v40 = vadd.f32 %v1373_v34, %v1565_v24  ;;  %v517_v41 = vpop.f32.mrb[3].mxu0  ;;  %v581_v42 = vpop.f32.mrb[3].mxu1  ;;  %v845_v43 = vsel %vm781_vm0, %v749_v27, %v813_v35  ;;  %v861_v44 = vsel %vm797_vm1, %v765_v28, %v829_v36 }
 0x100   : > { %v748_v45 = vadd.f32 %v1565_v24, %v517_v41  ;;  %v764_v46 = vadd.f32 %v1565_v24, %v581_v42  ;;  %v843_v51 = vsel %vm779_vm2, %v747_v31, %v811_v37  ;;  %v859_v52 = vsel %vm795_vm3, %v763_v32, %v827_v38 }
 0x101   : > { %vm782_vm4 = vcmp.ge.f32.partialorder %v750_v39, 0.0  ;;  %v814_v47 = vmul.f32 0.2, %v750_v39  ;;  %vm798_vm5 = vcmp.ge.f32.partialorder %v766_v40, 0.0  ;;  %v830_v48 = vmul.f32 0.2, %v766_v40 }
 0x102   : > { %vm780_vm6 = vcmp.ge.f32.partialorder %v748_v45, 0.0  ;;  %v812_v49 = vmul.f32 0.2, %v748_v45  ;;  %vm796_vm7 = vcmp.ge.f32.partialorder %v764_v46, 0.0  ;;  %v828_v50 = vmul.f32 0.2, %v764_v46 }
 0x103   : > { %v846_v53 = vsel %vm782_vm4, %v750_v39, %v814_v47  ;;  %v862_v54 = vsel %vm798_vm5, %v766_v40, %v830_v48  ;;  %v1360_v55 = vpop.f32.mrb[4].mxu0  ;;  %v1376_v56 = vpop.f32.mrb[4].mxu1 }
 0x104   : > { %v1227_v57 = vpack.c.bf16 %v846_v53, %v845_v43  ;;  %v1267_v58 = vpack.c.bf16 %v862_v54, %v861_v44  ;;  %v844_v59 = vsel %vm780_vm6, %v748_v45, %v812_v49  ;;  %v860_v60 = vsel %vm796_vm7, %v764_v46, %v828_v50  ;;  %v530_v61 = vpop.f32.mrb[5].mxu0  ;;  %v594_v62 = vpop.f32.mrb[5].mxu1 }
 0x105   : > { %v1222_v63 = vpack.c.bf16 %v844_v59, %v843_v51  ;;  %v1262_v0 = vpack.c.bf16 %v860_v60, %v859_v52  ;;  %v753_v1 = vadd.f32 %v1360_v55, %v1565_v24  ;;  %v769_v2 = vadd.f32 %v1376_v56, %v1565_v24  ;;  %v1361_v3 = vpop.f32.mrb[6].mxu0  ;;  %v1377_v4 = vpop.f32.mrb[6].mxu1 }
 0x106   : > { %1299 = vst [vmem:[%s1582_s17 + $0x8] sm:$0xff] %v1227_v57   ;;  %1307 = vst [vmem:[%s1582_s17 + $0x48] sm:$0xff] %v1267_v58   ;;  %v751_v5 = vadd.f32 %v1565_v24, %v530_v61  ;;  %v767_v6 = vadd.f32 %v1565_v24, %v594_v62  ;;  %v754_v7 = vadd.f32 %v1361_v3, %v1565_v24  ;;  %v533_v9 = vpop.f32.mrb[7].mxu0  ;;  %v597_v10 = vpop.f32.mrb[7].mxu1 }
 0x107   : > { %v770_v8 = vadd.f32 %v1377_v4, %v1565_v24  ;;  %1223 = vst [vmem:[%s1582_s17] sm:$0xff] %v1222_v63   ;;  %1306 = vst [vmem:[%s1582_s17 + $0x40] sm:$0xff] %v1262_v0   ;;  %vm785_vm8 = vcmp.ge.f32.partialorder %v753_v1, 0.0  ;;  %v817_v11 = vmul.f32 0.2, %v753_v1  ;;  %vm801_vm9 = vcmp.ge.f32.partialorder %v769_v2, 0.0 }
 0x108   : > { %v833_v12 = vmul.f32 0.2, %v769_v2  ;;  %vm783_vm10 = vcmp.ge.f32.partialorder %v751_v5, 0.0  ;;  %v815_v13 = vmul.f32 0.2, %v751_v5  ;;  %vm799_vm11 = vcmp.ge.f32.partialorder %v767_v6, 0.0 }
 0x109   : > { %v849_v14 = vsel %vm785_vm8, %v753_v1, %v817_v11  ;;  %v831_v15 = vmul.f32 0.2, %v767_v6  ;;  %vm786_vm12 = vcmp.ge.f32.partialorder %v754_v7, 0.0  ;;  %v818_v16 = vmul.f32 0.2, %v754_v7 }
 0x10a   : > { %v865_v17 = vsel %vm801_vm9, %v769_v2, %v833_v12  ;;  %v847_v18 = vsel %vm783_vm10, %v751_v5, %v815_v13  ;;  %vm802_vm13 = vcmp.ge.f32.partialorder %v770_v8, 0.0  ;;  %v834_v19 = vmul.f32 0.2, %v770_v8  ;;  %v1364_v20 = vpop.f32.mrb[8].mxu0  ;;  %v1380_v21 = vpop.f32.mrb[8].mxu1 }
 0x10b   : > { %v850_v22 = vsel %vm786_vm12, %v754_v7, %v818_v16  ;;  %v752_v23 = vadd.f32 %v1565_v24, %v533_v9  ;;  %v768_v25 = vadd.f32 %v1565_v24, %v597_v10  ;;  %v757_v26 = vadd.f32 %v1364_v20, %v1565_v24  ;;  %v546_v27 = vpop.f32.mrb[9].mxu0  ;;  %v610_v28 = vpop.f32.mrb[9].mxu1 }
 0x10c   : > { %v1237_v29 = vpack.c.bf16 %v850_v22, %v849_v14  ;;  %v866_v30 = vsel %vm802_vm13, %v770_v8, %v834_v19  ;;  %v773_v31 = vadd.f32 %v1380_v21, %v1565_v24  ;;  %v755_v32 = vadd.f32 %v1565_v24, %v546_v27  ;;  %v1365_v33 = vpop.f32.mrb[10].mxu0  ;;  %v1381_v34 = vpop.f32.mrb[10].mxu1 }
 0x10d   : > { %v1277_v35 = vpack.c.bf16 %v866_v30, %v865_v17  ;;  %vm784_vm14 = vcmp.ge.f32.partialorder %v752_v23, 0.0  ;;  %v816_v36 = vmul.f32 0.2, %v752_v23  ;;  %vm800_vm15 = vcmp.ge.f32.partialorder %v768_v25, 0.0  ;;  %v549_v37 = vpop.f32.mrb[11].mxu0  ;;  %v613_v38 = vpop.f32.mrb[11].mxu1 }
 0x10e   : > { %1301 = vst [vmem:[%s1582_s17 + $0x18] sm:$0xff] %v1237_v29   ;;  %v832_v39 = vmul.f32 0.2, %v768_v25  ;;  %vm789_vm0 = vcmp.ge.f32.partialorder %v757_v26, 0.0  ;;  %v821_v40 = vmul.f32 0.2, %v757_v26  ;;  %v863_v41 = vsel %vm799_vm11, %v767_v6, %v831_v15 }
 0x10f   : > { %vm805_vm1 = vcmp.ge.f32.partialorder %v773_v31, 0.0  ;;  %1309 = vst [vmem:[%s1582_s17 + $0x58] sm:$0xff] %v1277_v35   ;;  %v848_v42 = vsel %vm784_vm14, %v752_v23, %v816_v36  ;;  %v837_v43 = vmul.f32 0.2, %v773_v31  ;;  %vm787_vm2 = vcmp.ge.f32.partialorder %v755_v32, 0.0 }
 0x110   : > { %v1232_v44 = vpack.c.bf16 %v848_v42, %v847_v18  ;;  %v864_v45 = vsel %vm800_vm15, %v768_v25, %v832_v39  ;;  %v819_v46 = vmul.f32 0.2, %v755_v32  ;;  %v771_v47 = vadd.f32 %v1565_v24, %v610_v28 }
 0x111   : > { %v1272_v48 = vpack.c.bf16 %v864_v45, %v863_v41  ;;  %v853_v49 = vsel %vm789_vm0, %v757_v26, %v821_v40  ;;  %v869_v50 = vsel %vm805_vm1, %v773_v31, %v837_v43  ;;  %v758_v51 = vadd.f32 %v1365_v33, %v1565_v24 }
 0x112   : > { %1300 = vst [vmem:[%s1582_s17 + $0x10] sm:$0xff] %v1232_v44   ;;  %vm803_vm3 = vcmp.ge.f32.partialorder %v771_v47, 0.0  ;;  %v835_v52 = vmul.f32 0.2, %v771_v47  ;;  %v774_v53 = vadd.f32 %v1381_v34, %v1565_v24  ;;  %v756_v54 = vadd.f32 %v1565_v24, %v549_v37  ;;  %v1368_v55 = vpop.f32.mrb[12].mxu0  ;;  %v1384_v56 = vpop.f32.mrb[12].mxu1 }
 0x113   : > { %1308 = vst [vmem:[%s1582_s17 + $0x50] sm:$0xff] %v1272_v48   ;;  %vm790_vm4 = vcmp.ge.f32.partialorder %v758_v51, 0.0  ;;  %v822_v57 = vmul.f32 0.2, %v758_v51  ;;  %v772_v58 = vadd.f32 %v1565_v24, %v613_v38  ;;  %v761_v59 = vadd.f32 %v1368_v55, %v1565_v24  ;;  %v562_v60 = vpop.f32.mrb[13].mxu0  ;;  %v626_v61 = vpop.f32.mrb[13].mxu1 }
 0x114   : > { %v851_v62 = vsel %vm787_vm2, %v755_v32, %v819_v46  ;;  %vm806_vm5 = vcmp.ge.f32.partialorder %v774_v53, 0.0  ;;  %v838_v63 = vmul.f32 0.2, %v774_v53  ;;  %vm788_vm6 = vcmp.ge.f32.partialorder %v756_v54, 0.0  ;;  %v1369_v0 = vpop.f32.mrb[14].mxu0  ;;  %v1385_v1 = vpop.f32.mrb[14].mxu1 }
 0x115   : > { %v854_v2 = vsel %vm790_vm4, %v758_v51, %v822_v57  ;;  %v820_v3 = vmul.f32 0.2, %v756_v54  ;;  %vm804_vm7 = vcmp.ge.f32.partialorder %v772_v58, 0.0  ;;  %v836_v4 = vmul.f32 0.2, %v772_v58  ;;  %v565_v5 = vpop.f32.mrb[15].mxu0 }
 0x116   : > { %v867_v6 = vsel %vm803_vm3, %v771_v47, %v835_v52  ;;  %v1247_v7 = vpack.c.bf16 %v854_v2, %v853_v49  ;;  %v870_v8 = vsel %vm806_vm5, %v774_v53, %v838_v63  ;;  %v825_v9 = vmul.f32 0.2, %v761_v59  ;;  %v629_v10 = vpop.f32.mrb[15].mxu1 }
 0x117   : > { %v1287_v11 = vpack.c.bf16 %v870_v8, %v869_v50  ;;  %v852_v12 = vsel %vm788_vm6, %v756_v54, %v820_v3  ;;  %v868_v13 = vsel %vm804_vm7, %v772_v58, %v836_v4  ;;  %v777_v14 = vadd.f32 %v1384_v56, %v1565_v24 }
 0x118   : > { %1303 = vst [vmem:[%s1582_s17 + $0x28] sm:$0xff] %v1247_v7   ;;  %v1242_v15 = vpack.c.bf16 %v852_v12, %v851_v62  ;;  %v1282_v16 = vpack.c.bf16 %v868_v13, %v867_v6  ;;  %vm793_vm8 = vcmp.ge.f32.partialorder %v761_v59, 0.0  ;;  %v759_v17 = vadd.f32 %v1565_v24, %v562_v60 }
 0x119   : > { %1311 = vst [vmem:[%s1582_s17 + $0x68] sm:$0xff] %v1287_v11   ;;  %vm809_vm9 = vcmp.ge.f32.partialorder %v777_v14, 0.0  ;;  %v841_v18 = vmul.f32 0.2, %v777_v14  ;;  %v775_v19 = vadd.f32 %v1565_v24, %v626_v61  ;;  %v762_v20 = vadd.f32 %v1369_v0, %v1565_v24 }
 0x11a   : > { %1302 = vst [vmem:[%s1582_s17 + $0x20] sm:$0xff] %v1242_v15   ;;  %1310 = vst [vmem:[%s1582_s17 + $0x60] sm:$0xff] %v1282_v16   ;;  %v823_v21 = vmul.f32 0.2, %v759_v17  ;;  %v778_v22 = vadd.f32 %v1385_v1, %v1565_v24  ;;  %v760_v23 = vadd.f32 %v1565_v24, %v565_v5  ;;  %v857_v25 = vsel %vm793_vm8, %v761_v59, %v825_v9 }
 0x11b   : > { %vm791_vm10 = vcmp.ge.f32.partialorder %v759_v17, 0.0  ;;  %vm794_vm11 = vcmp.ge.f32.partialorder %v762_v20, 0.0  ;;  %v873_v26 = vsel %vm809_vm9, %v777_v14, %v841_v18  ;;  %v826_v27 = vmul.f32 0.2, %v762_v20 }
 0x11c   : > { %vm810_vm12 = vcmp.ge.f32.partialorder %v778_v22, 0.0  ;;  %v842_v28 = vmul.f32 0.2, %v778_v22  ;;  %vm807_vm13 = vcmp.ge.f32.partialorder %v775_v19, 0.0  ;;  %vm792_vm14 = vcmp.ge.f32.partialorder %v760_v23, 0.0 }
 0x11d   : > { %v824_v29 = vmul.f32 0.2, %v760_v23  ;;  %v776_v30 = vadd.f32 %v1565_v24, %v629_v10  ;;  %v855_v31 = vsel %vm791_vm10, %v759_v17, %v823_v21  ;;  %v839_v32 = vmul.f32 0.2, %v775_v19 }
 0x11e   : > { %v858_v33 = vsel %vm794_vm11, %v762_v20, %v826_v27  ;;  %v874_v34 = vsel %vm810_vm12, %v778_v22, %v842_v28 }
 0x11f   : > { %v1257_v35 = vpack.c.bf16 %v858_v33, %v857_v25  ;;  %v1297_v36 = vpack.c.bf16 %v874_v34, %v873_v26  ;;  %v856_v37 = vsel %vm792_vm14, %v760_v23, %v824_v29  ;;  %vm808_vm15 = vcmp.ge.f32.partialorder %v776_v30, 0.0 }
 0x120   : > { %v1252_v38 = vpack.c.bf16 %v856_v37, %v855_v31  ;;  %v840_v39 = vmul.f32 0.2, %v776_v30  ;;  %v871_v40 = vsel %vm807_vm13, %v775_v19, %v839_v32 }
 0x121   : > { %1305 = vst [vmem:[%s1582_s17 + $0x38] sm:$0xff] %v1257_v35   ;;  %1313 = vst [vmem:[%s1582_s17 + $0x78] sm:$0xff] %v1297_v36  }
 0x122   : > { %1304 = vst [vmem:[%s1582_s17 + $0x30] sm:$0xff] %v1252_v38   ;;  %v872_v41 = vsel %vm808_vm15, %v776_v30, %v840_v39 }
 0x123   : > { %v1292_v42 = vpack.c.bf16 %v872_v41, %v871_v40 }
 0x125   : > { %1312 = vst [vmem:[%s1582_s17 + $0x70] sm:$0xff] %v1292_v42  }
 0x126 PF: > { %s13_s14 = sadd.s32 1, %s1472_s14   ;;  %s1641_s12 = smov %s1468_s13 }
 0x127   : > { %p10_p5 = scmp.ge.s32.totalorder %s13_s14, 4   ;;  %s1642_s13 = smov %s1644_s15 }
 0x129   :  { %12 = sbr.rel (!%p10_p5) target bundleno = 2 (0x2), region = 73 }

// kernel: _lambda_.9
= control target key start
LH: loop header
LB: loop body
LE: loop exit
PB: predicated region body
PF: predicated region fallthrough
CT: control target
= control target key end

     0   :  { %v675_v32 = vmov 0.0   ;;  %s881_s1 = inlined_call_operand.vmem [shape: bf16[256,128], index: 1, kind: input, shape index: {}]   ;;  %s882_s0 = inlined_call_operand.vmem [shape: bf16[128,256], index: 0, kind: input, shape index: {}]   ;;  %s883_s3 = inlined_call_operand.vmem [shape: f32[1,128], index: 3, kind: output, shape index: {1}]   ;;  %s884_s4 = inlined_call_operand.vmem [shape: f32[1,128], index: 4, kind: output, shape index: {2}]   ;;  %s885_s2 = inlined_call_operand.vmem [shape: f32[128,128], index: 2, kind: output, shape index: {0}]  }
   0x1   :  { %v635_v0 = vld [vmem:[%s881_s1 + $0x40] sm:$0xff]   ;;  %v637_v2 = vld [vmem:[%s881_s1 + $0x48] sm:$0xff]   ;;  %v639_v4 = vld [vmem:[%s881_s1 + $0x50] sm:$0xff]   ;;  %409 = vst [vmem:[%s883_s3] sm:$0x1] %v675_v32 }
   0x2   :  { %v636_v1 = vld [vmem:[%s881_s1] sm:$0xff]   ;;  %554 = vmatprep.subr.bf16.mxu0 %v635_v0  ;;  %618 = vmatprep.subr.bf16.mxu1 %v635_v0  ;;  %v638_v3 = vld [vmem:[%s881_s1 + $0x8] sm:$0xff]   ;;  %v640_v5 = vld [vmem:[%s881_s1 + $0x10] sm:$0xff]   ;;  %410 = vst [vmem:[%s884_s4] sm:$0x1] %v675_v32 }
   0x3   :  { %555 = vmatpush3.bf16.msra.mxu0 %v636_v1  ;;  %626 = vmatpush3.bf16.msra.mxu1 %v636_v1  ;;  %v641_v6 = vld [vmem:[%s881_s1 + $0x58] sm:$0xff]   ;;  %v643_v8 = vld [vmem:[%s881_s1 + $0x60] sm:$0xff]   ;;  %v645_v10 = vld [vmem:[%s881_s1 + $0x68] sm:$0xff]  }
   0x4   :  { %556 = vmatprep.subr.bf16.mxu0 %v637_v2  ;;  %619 = vmatprep.subr.bf16.mxu1 %v637_v2  ;;  %v642_v7 = vld [vmem:[%s881_s1 + $0x18] sm:$0xff]   ;;  %v644_v9 = vld [vmem:[%s881_s1 + $0x20] sm:$0xff]   ;;  %v646_v12 = vld [vmem:[%s881_s1 + $0x28] sm:$0xff]  }
   0x5   :  { %v653_v11 = vld [vmem:[%s882_s0 + $0x4] ss:$8 sps:$4 sm:$0xff]   ;;  %v647_v14 = vld [vmem:[%s881_s1 + $0x70] sm:$0xff]   ;;  %v649_v16 = vld [vmem:[%s881_s1 + $0x78] sm:$0xff]  }
   0x6   :  { %v659_v13 = vld [vmem:[%s882_s0 + $0x44] ss:$8 sps:$4 sm:$0xff]   ;;  %307 = vmatprep.mubr.bf16.mxu0 %v653_v11  ;;  %v648_v15 = vld [vmem:[%s881_s1 + $0x30] sm:$0xff]   ;;  %v650_v17 = vld [vmem:[%s881_s1 + $0x38] sm:$0xff]  }
   0x7   :  { %557 = vmatpush3.bf16.msra.mxu0 %v638_v3  ;;  %627 = vmatpush3.bf16.msra.mxu1 %v638_v3  ;;  %v651_v18 = vld [vmem:[%s882_s0] ss:$8 sps:$4 sm:$0xff]   ;;  %v654_v20 = vld [vmem:[%s882_s0 + $0x14] ss:$8 sps:$4 sm:$0xff]   ;;  %v656_v22 = vld [vmem:[%s882_s0 + $0x10] ss:$8 sps:$4 sm:$0xff]  }
   0x8   :  { %558 = vmatprep.subr.bf16.mxu0 %v639_v4  ;;  %620 = vmatprep.subr.bf16.mxu1 %v639_v4  ;;  %v657_v19 = vld [vmem:[%s882_s0 + $0x40] ss:$8 sps:$4 sm:$0xff]   ;;  %v663_v21 = vld [vmem:[%s882_s0 + $0x54] ss:$8 sps:$4 sm:$0xff]   ;;  %v665_v23 = vld [vmem:[%s882_s0 + $0x50] ss:$8 sps:$4 sm:$0xff]  }
   0x9   :  { %339 = vmatprep.mubr.bf16.mxu1 %v659_v13  ;;  %v660_v24 = vld [vmem:[%s882_s0 + $0x24] ss:$8 sps:$4 sm:$0xff]   ;;  %v662_v26 = vld [vmem:[%s882_s0 + $0x20] ss:$8 sps:$4 sm:$0xff]   ;;  %v666_v28 = vld [vmem:[%s882_s0 + $0x34] ss:$8 sps:$4 sm:$0xff]  }
   0xa   :  { %v669_v25 = vld [vmem:[%s882_s0 + $0x64] ss:$8 sps:$4 sm:$0xff]   ;;  %v671_v27 = vld [vmem:[%s882_s0 + $0x60] ss:$8 sps:$4 sm:$0xff]   ;;  %v672_v29 = vld [vmem:[%s882_s0 + $0x74] ss:$8 sps:$4 sm:$0xff]  }
   0xb   :  { %559 = vmatpush3.bf16.msra.mxu0 %v640_v5  ;;  %628 = vmatpush3.bf16.msra.mxu1 %v640_v5  ;;  %v668_v30 = vld [vmem:[%s882_s0 + $0x30] ss:$8 sps:$4 sm:$0xff]  }
   0xc   :  { %560 = vmatprep.subr.bf16.mxu0 %v641_v6  ;;  %621 = vmatprep.subr.bf16.mxu1 %v641_v6  ;;  %v674_v31 = vld [vmem:[%s882_s0 + $0x70] ss:$8 sps:$4 sm:$0xff]  }
   0xf   :  { %561 = vmatpush3.bf16.msra.mxu0 %v642_v7  ;;  %629 = vmatpush3.bf16.msra.mxu1 %v642_v7 }
  0x10   :  { %562 = vmatprep.subr.bf16.mxu0 %v643_v8  ;;  %622 = vmatprep.subr.bf16.mxu1 %v643_v8 }
  0x13   :  { %563 = vmatpush3.bf16.msra.mxu0 %v644_v9  ;;  %630 = vmatpush3.bf16.msra.mxu1 %v644_v9 }
  0x14   :  { %564 = vmatprep.subr.bf16.mxu0 %v645_v10  ;;  %623 = vmatprep.subr.bf16.mxu1 %v645_v10 }
  0x17   :  { %565 = vmatpush3.bf16.msra.mxu0 %v646_v12  ;;  %631 = vmatpush3.bf16.msra.mxu1 %v646_v12 }
  0x18   :  { %566 = vmatprep.subr.bf16.mxu0 %v647_v14  ;;  %624 = vmatprep.subr.bf16.mxu1 %v647_v14 }
  0x1b   :  { %567 = vmatpush3.bf16.msra.mxu0 %v648_v15  ;;  %632 = vmatpush3.bf16.msra.mxu1 %v648_v15 }
  0x1c   :  { %568 = vmatprep.subr.bf16.mxu0 %v649_v16  ;;  %625 = vmatprep.subr.bf16.mxu1 %v649_v16 }
  0x1f   :  { %569 = vmatpush3.bf16.msra.mxu0 %v650_v17  ;;  %633 = vmatpush3.bf16.msra.mxu1 %v650_v17 }
  0x22   :  { %308 = vmatmul.mubr.bf16.vlgmr.msra.gmra.mrb[0].mxu0 %v651_v18  ;;  %340 = vmatmul.mubr.bf16.vlgmr.msra.gmra.mrb[0].mxu1 %v657_v19 }
  0x23   :  { %315 = vmatprep.mubr.bf16.mxu0 %v654_v20  ;;  %347 = vmatprep.mubr.bf16.mxu1 %v663_v21 }
  0x2a   :  { %316 = vmatmul.mubr.bf16.gmra.mrb[4].mxu0 %v656_v22  ;;  %348 = vmatmul.mubr.bf16.gmra.mrb[4].mxu1 %v665_v23 }
  0x2b   :  { %323 = vmatprep.mubr.bf16.mxu0 %v660_v24  ;;  %355 = vmatprep.mubr.bf16.mxu1 %v669_v25 }
  0x32   :  { %324 = vmatmul.mubr.bf16.gmra.mrb[8].mxu0 %v662_v26  ;;  %356 = vmatmul.mubr.bf16.gmra.mrb[8].mxu1 %v671_v27 }
  0x33   :  { %331 = vmatprep.mubr.bf16.mxu0 %v666_v28  ;;  %363 = vmatprep.mubr.bf16.mxu1 %v672_v29 }
  0x3a   :  { %332 = vmatmul.mubr.bf16.gmra.mrb[12].mxu0 %v668_v30  ;;  %364 = vmatmul.mubr.bf16.gmra.mrb[12].mxu1 %v674_v31 }
  0xf5   :  { %v570_v33 = vpop.f32.mrb[0].mxu0  ;;  %v594_v34 = vpop.f32.mrb[0].mxu1 }
  0xf6   :  { %v571_v35 = vpop.f32.mrb[1].mxu0  ;;  %v595_v36 = vpop.f32.mrb[1].mxu1 }
  0xf7   :  { %v572_v37 = vadd.f32 %v571_v35, %v570_v33  ;;  %v573_v38 = vpop.f32.mrb[2].mxu0  ;;  %v803_v39 = vadd.f32 %v595_v36, %v594_v34  ;;  %v597_v40 = vpop.f32.mrb[2].mxu1 }
  0xf8   :  { %v574_v41 = vpop.f32.mrb[3].mxu0  ;;  %v598_v42 = vpop.f32.mrb[3].mxu1 }
  0xf9   :  { %430 = vst [vmem:[%s885_s2] sm:$0xff] %v572_v37  ;;  %v575_v43 = vadd.f32 %v574_v41, %v573_v38  ;;  %438 = vst [vmem:[%s885_s2 + $0x40] sm:$0xff] %v803_v39  ;;  %v812_v44 = vadd.f32 %v598_v42, %v597_v40  ;;  %v471_v45 = vmul.f32 %v572_v37, %v572_v37 }
  0xfa   :  { %v479_v38 = vmul.f32 %v803_v39, %v803_v39 }
  0xfb   :  { %431 = vst [vmem:[%s885_s2 + $0x8] sm:$0xff] %v575_v43  ;;  %v447_v46 = vadd.f32 %v575_v43, %v572_v37  ;;  %v472_v47 = vmul.f32 %v575_v43, %v575_v43  ;;  %439 = vst [vmem:[%s885_s2 + $0x48] sm:$0xff] %v812_v44  ;;  %v480_v42 = vmul.f32 %v812_v44, %v812_v44 }
  0xfd   :  { %v487_v48 = vadd.f32 %v472_v47, %v471_v45  ;;  %v576_v49 = vpop.f32.mrb[4].mxu0  ;;  %v600_v50 = vpop.f32.mrb[4].mxu1 }
  0xfe   :  { %v577_v51 = vpop.f32.mrb[5].mxu0  ;;  %v601_v52 = vpop.f32.mrb[5].mxu1 }
  0xff   :  { %v578_v53 = vadd.f32 %v577_v51, %v576_v49  ;;  %v579_v54 = vpop.f32.mrb[6].mxu0  ;;  %v821_v55 = vadd.f32 %v601_v52, %v600_v50  ;;  %v603_v56 = vpop.f32.mrb[6].mxu1 }
 0x100   :  { %v580_v57 = vpop.f32.mrb[7].mxu0  ;;  %v604_v58 = vpop.f32.mrb[7].mxu1 }
 0x101   :  { %432 = vst [vmem:[%s885_s2 + $0x10] sm:$0xff] %v578_v53  ;;  %v448_v59 = vadd.f32 %v578_v53, %v447_v46  ;;  %v473_v60 = vmul.f32 %v578_v53, %v578_v53  ;;  %v581_v61 = vadd.f32 %v580_v57, %v579_v54  ;;  %440 = vst [vmem:[%s885_s2 + $0x50] sm:$0xff] %v821_v55 }
 0x102   :  { %v605_v62 = vadd.f32 %v604_v58, %v603_v56  ;;  %v481_v46 = vmul.f32 %v821_v55, %v821_v55 }
 0x103   :  { %v488_v63 = vadd.f32 %v487_v48, %v473_v60  ;;  %433 = vst [vmem:[%s885_s2 + $0x18] sm:$0xff] %v581_v61  ;;  %v449_v0 = vadd.f32 %v581_v61, %v448_v59  ;;  %v474_v1 = vmul.f32 %v581_v61, %v581_v61 }
 0x104   :  { %441 = vst [vmem:[%s885_s2 + $0x58] sm:$0xff] %v605_v62  ;;  %v482_v49 = vmul.f32 %v605_v62, %v605_v62 }
 0x105   :  { %v489_v2 = vadd.f32 %v488_v63, %v474_v1  ;;  %v582_v3 = vpop.f32.mrb[8].mxu0  ;;  %v606_v4 = vpop.f32.mrb[8].mxu1 }
 0x106   :  { %v583_v5 = vpop.f32.mrb[9].mxu0  ;;  %v607_v6 = vpop.f32.mrb[9].mxu1 }
 0x107   :  { %v584_v7 = vadd.f32 %v583_v5, %v582_v3  ;;  %v585_v8 = vpop.f32.mrb[10].mxu0  ;;  %v608_v9 = vadd.f32 %v607_v6, %v606_v4  ;;  %v609_v10 = vpop.f32.mrb[10].mxu1 }
 0x108   :  { %v586_v11 = vpop.f32.mrb[11].mxu0  ;;  %v610_v12 = vpop.f32.mrb[11].mxu1 }
 0x109   :  { %434 = vst [vmem:[%s885_s2 + $0x20] sm:$0xff] %v584_v7  ;;  %v450_v13 = vadd.f32 %v584_v7, %v449_v0  ;;  %v475_v14 = vmul.f32 %v584_v7, %v584_v7  ;;  %v587_v15 = vadd.f32 %v586_v11, %v585_v8  ;;  %442 = vst [vmem:[%s885_s2 + $0x60] sm:$0xff] %v608_v9  ;;  %v446_v8 = vld [vmem:[%s883_s3] sm:$0x1] }
 0x10a   :  { %v611_v16 = vadd.f32 %v610_v12, %v609_v10  ;;  %v483_v53 = vmul.f32 %v608_v9, %v608_v9  ;;  %v470_v11 = vld [vmem:[%s884_s4] sm:$0x1] }
 0x10b   :  { %v490_v17 = vadd.f32 %v489_v2, %v475_v14  ;;  %435 = vst [vmem:[%s885_s2 + $0x28] sm:$0xff] %v587_v15  ;;  %v451_v18 = vadd.f32 %v587_v15, %v450_v13  ;;  %v476_v19 = vmul.f32 %v587_v15, %v587_v15 }
 0x10c   :  { %443 = vst [vmem:[%s885_s2 + $0x68] sm:$0xff] %v611_v16  ;;  %v484_v57 = vmul.f32 %v611_v16, %v611_v16 }
 0x10d   :  { %v491_v20 = vadd.f32 %v490_v17, %v476_v19  ;;  %v588_v21 = vpop.f32.mrb[12].mxu0  ;;  %v612_v22 = vpop.f32.mrb[12].mxu1 }
 0x10e   :  { %v589_v23 = vpop.f32.mrb[13].mxu0  ;;  %v613_v24 = vpop.f32.mrb[13].mxu1 }
 0x10f   :  { %v590_v25 = vadd.f32 %v589_v23, %v588_v21  ;;  %v591_v26 = vpop.f32.mrb[14].mxu0  ;;  %v614_v27 = vadd.f32 %v613_v24, %v612_v22  ;;  %v615_v28 = vpop.f32.mrb[14].mxu1 }
 0x110   :  { %v592_v29 = vpop.f32.mrb[15].mxu0  ;;  %v616_v30 = vpop.f32.mrb[15].mxu1 }
 0x111   :  { %436 = vst [vmem:[%s885_s2 + $0x30] sm:$0xff] %v590_v25  ;;  %v452_v31 = vadd.f32 %v590_v25, %v451_v18  ;;  %v477_v32 = vmul.f32 %v590_v25, %v590_v25  ;;  %v593_v33 = vadd.f32 %v592_v29, %v591_v26  ;;  %444 = vst [vmem:[%s885_s2 + $0x70] sm:$0xff] %v614_v27 }
 0x112   :  { %v617_v34 = vadd.f32 %v616_v30, %v615_v28  ;;  %v485_v58 = vmul.f32 %v614_v27, %v614_v27 }
 0x113   :  { %v492_v35 = vadd.f32 %v491_v20, %v477_v32  ;;  %437 = vst [vmem:[%s885_s2 + $0x38] sm:$0xff] %v593_v33  ;;  %v453_v36 = vadd.f32 %v593_v33, %v452_v31  ;;  %v478_v37 = vmul.f32 %v593_v33, %v593_v33 }
 0x114   :  { %445 = vst [vmem:[%s885_s2 + $0x78] sm:$0xff] %v617_v34  ;;  %v486_v63 = vmul.f32 %v617_v34, %v617_v34 }
 0x115   :  { %v454_v40 = vadd.f32 %v803_v39, %v453_v36  ;;  %v493_v41 = vadd.f32 %v492_v35, %v478_v37 }
 0x117   :  { %v455_v43 = vadd.f32 %v812_v44, %v454_v40  ;;  %v494_v45 = vadd.f32 %v493_v41, %v479_v38 }
 0x119   :  { %v495_v47 = vadd.f32 %v494_v45, %v480_v42  ;;  %v456_v48 = vadd.f32 %v821_v55, %v455_v43 }
 0x11b   :  { %v457_v50 = vadd.f32 %v605_v62, %v456_v48  ;;  %v496_v51 = vadd.f32 %v495_v47, %v481_v46 }
 0x11d   :  { %v458_v52 = vadd.f32 %v608_v9, %v457_v50  ;;  %v497_v54 = vadd.f32 %v496_v51, %v482_v49 }
 0x11f   :  { %v498_v39 = vadd.f32 %v497_v54, %v483_v53  ;;  %v459_v56 = vadd.f32 %v611_v16, %v458_v52 }
 0x121   :  { %v499_v59 = vadd.f32 %v498_v39, %v484_v57  ;;  %v460_v60 = vadd.f32 %v614_v27, %v459_v56 }
 0x123   :  { %v500_v44 = vadd.f32 %v499_v59, %v485_v58  ;;  %v461_v61 = vadd.f32 %v617_v34, %v460_v60 }
 0x125   :  { %v462_v0 = vrot.slane %v461_v61, 4  ;;  %v501_v1 = vadd.f32 %v500_v44, %v486_v63 }
 0x127   :  { %v463_v2 = vadd.f32 %v462_v0, %v461_v61  ;;  %v502_v3 = vrot.slane %v501_v1, 4 }
 0x129   :  { %v464_v55 = vrot.slane %v463_v2, 2  ;;  %v503_v4 = vadd.f32 %v502_v3, %v501_v1 }
 0x12b   :  { %v465_v62 = vadd.f32 %v464_v55, %v463_v2  ;;  %v504_v5 = vrot.slane %v503_v4, 2 }
 0x12d   :  { %v466_v6 = vrot.slane %v465_v62, 1  ;;  %v505_v7 = vadd.f32 %v504_v5, %v503_v4 }
 0x12f   :  { %v467_v9 = vadd.f32 %v466_v6, %v465_v62  ;;  %v506_v10 = vrot.slane %v505_v7, 1 }
 0x131   :  { %v468_v12 = vadd.f32 %v467_v9, %v446_v8  ;;  %v507_v13 = vadd.f32 %v506_v10, %v505_v7 }
 0x133   :  { %469 = vst [vmem:[%s883_s3] sm:$0x1] %v468_v12  ;;  %v508_v14 = vadd.f32 %v507_v13, %v470_v11 }
 0x135   :  { %509 = vst [vmem:[%s884_s4] sm:$0x1] %v508_v14 }

// kernel: _lambda_.10
= control target key start
LH: loop header
LB: loop body
LE: loop exit
PB: predicated region body
PF: predicated region fallthrough
CT: control target
= control target key end

     0   :  { %s423_s0 = inlined_call_operand.vmem [shape: f32[128,128], index: 0, kind: input, shape index: {}]   ;;  %s424_s1 = inlined_call_operand.vmem [shape: f32[1,128], index: 1, kind: input, shape index: {}]   ;;  %s425_s2 = inlined_call_operand.vmem [shape: f32[1,128], index: 2, kind: input, shape index: {}]   ;;  %s426_s3 = inlined_call_operand.vmem [shape: bf16[128,128], index: 3, kind: output, shape index: {}]  }
   0x1   :  { %v14_v0 = vld [vmem:[%s423_s0] sm:$0xff]  ;;  %v15_v1 = vld [vmem:[%s423_s0 + $0x8] sm:$0xff]  ;;  %v16_v6 = vld [vmem:[%s423_s0 + $0x10] sm:$0xff] }
   0x2   :  { %v318_v2 = vld [vmem:[%s424_s1] ss:$0 sm:$0xff]  ;;  %v17_v7 = vld [vmem:[%s423_s0 + $0x18] sm:$0xff]  ;;  %v19_v11 = vld [vmem:[%s423_s0 + $0x28] sm:$0xff] }
   0x3   :  { %v37_v3 = vmul.f32 %v318_v2, %v14_v0  ;;  %v38_v4 = vmul.f32 %v318_v2, %v15_v1  ;;  %v325_v5 = vld [vmem:[%s425_s2] ss:$0 sm:$0xff]  ;;  %v39_v8 = vmul.f32 %v318_v2, %v16_v6  ;;  %v40_v9 = vmul.f32 %v318_v2, %v17_v7  ;;  %v20_v12 = vld [vmem:[%s423_s0 + $0x30] sm:$0xff]  ;;  %v21_v17 = vld [vmem:[%s423_s0 + $0x38] sm:$0xff] }
   0x4   :  { %v18_v10 = vld [vmem:[%s423_s0 + $0x20] sm:$0xff]  ;;  %v42_v16 = vmul.f32 %v318_v2, %v19_v11  ;;  %v43_v20 = vmul.f32 %v318_v2, %v20_v12  ;;  %v44_v21 = vmul.f32 %v318_v2, %v21_v17  ;;  %v23_v35 = vld [vmem:[%s423_s0 + $0x48] sm:$0xff]  ;;  %v24_v36 = vld [vmem:[%s423_s0 + $0x50] sm:$0xff] }
   0x5   :  { %v60_v13 = vadd.f32 %v325_v5, %v37_v3  ;;  %v61_v14 = vadd.f32 %v325_v5, %v38_v4  ;;  %v41_v15 = vmul.f32 %v318_v2, %v18_v10  ;;  %v62_v18 = vadd.f32 %v325_v5, %v39_v8  ;;  %v22_v34 = vld [vmem:[%s423_s0 + $0x40] sm:$0xff]  ;;  %v25_v42 = vld [vmem:[%s423_s0 + $0x58] sm:$0xff]  ;;  %v27_v48 = vld [vmem:[%s423_s0 + $0x68] sm:$0xff] }
   0x6   :  { %v63_v19 = vadd.f32 %v325_v5, %v40_v9  ;;  %v65_v29 = vadd.f32 %v325_v5, %v42_v16  ;;  %v66_v33 = vadd.f32 %v325_v5, %v43_v20  ;;  %v67_v40 = vadd.f32 %v325_v5, %v44_v21  ;;  %v26_v47 = vld [vmem:[%s423_s0 + $0x60] sm:$0xff]  ;;  %v28_v60 = vld [vmem:[%s423_s0 + $0x70] sm:$0xff]  ;;  %v29_v7 = vld [vmem:[%s423_s0 + $0x78] sm:$0xff] }
   0x7   :  { %vm76_vm0 = vcmp.ge.f32.partialorder %v60_v13, 0.0  ;;  %vm77_vm1 = vcmp.ge.f32.partialorder %v61_v14, 0.0  ;;  %v92_v22 = vmul.f32 0.2, %v60_v13  ;;  %v93_v23 = vmul.f32 0.2, %v61_v14 }
   0x8   :  { %vm78_vm2 = vcmp.ge.f32.partialorder %v62_v18, 0.0  ;;  %vm79_vm3 = vcmp.ge.f32.partialorder %v63_v19, 0.0  ;;  %v94_v24 = vmul.f32 0.2, %v62_v18  ;;  %v95_v25 = vmul.f32 0.2, %v63_v19 }
   0x9   :  { %v108_v26 = vsel %vm76_vm0, %v60_v13, %v92_v22  ;;  %v109_v27 = vsel %vm77_vm1, %v61_v14, %v93_v23  ;;  %v64_v28 = vadd.f32 %v325_v5, %v41_v15  ;;  %vm81_vm5 = vcmp.ge.f32.partialorder %v65_v29, 0.0 }
   0xa   :  { %v245_v30 = vpack.c.bf16 %v109_v27, %v108_v26  ;;  %v110_v31 = vsel %vm78_vm2, %v62_v18, %v94_v24  ;;  %v111_v32 = vsel %vm79_vm3, %v63_v19, %v95_v25  ;;  %v97_v39 = vmul.f32 0.2, %v65_v29 }
   0xb   :  { %v250_v37 = vpack.c.bf16 %v111_v32, %v110_v31  ;;  %vm80_vm4 = vcmp.ge.f32.partialorder %v64_v28, 0.0  ;;  %v96_v38 = vmul.f32 0.2, %v64_v28  ;;  %vm82_vm6 = vcmp.ge.f32.partialorder %v66_v33, 0.0 }
   0xc   :  { %246 = vst [vmem:[%s426_s3] sm:$0xff] %v245_v30   ;;  %v98_v41 = vmul.f32 0.2, %v66_v33  ;;  %v45_v44 = vmul.f32 %v318_v2, %v22_v34  ;;  %v46_v45 = vmul.f32 %v318_v2, %v23_v35  ;;  %v47_v46 = vmul.f32 %v318_v2, %v24_v36 }
   0xd   :  { %282 = vst [vmem:[%s426_s3 + $0x8] sm:$0xff] %v250_v37   ;;  %v112_v43 = vsel %vm80_vm4, %v64_v28, %v96_v38  ;;  %v113_v49 = vsel %vm81_vm5, %v65_v29, %v97_v39  ;;  %vm83_vm7 = vcmp.ge.f32.partialorder %v67_v40, 0.0  ;;  %v99_v50 = vmul.f32 0.2, %v67_v40 }
   0xe   :  { %v114_v51 = vsel %vm82_vm6, %v66_v33, %v98_v41  ;;  %v255_v52 = vpack.c.bf16 %v113_v49, %v112_v43  ;;  %v68_v53 = vadd.f32 %v325_v5, %v45_v44  ;;  %v69_v54 = vadd.f32 %v325_v5, %v46_v45 }
   0xf   :  { %v48_v55 = vmul.f32 %v318_v2, %v25_v42  ;;  %v115_v56 = vsel %vm83_vm7, %v67_v40, %v99_v50  ;;  %v70_v57 = vadd.f32 %v325_v5, %v47_v46  ;;  %v49_v58 = vmul.f32 %v318_v2, %v26_v47 }
  0x10   :  { %v50_v59 = vmul.f32 %v318_v2, %v27_v48  ;;  %283 = vst [vmem:[%s426_s3 + $0x10] sm:$0xff] %v255_v52   ;;  %v260_v61 = vpack.c.bf16 %v115_v56, %v114_v51  ;;  %vm84_vm8 = vcmp.ge.f32.partialorder %v68_v53, 0.0  ;;  %vm85_vm9 = vcmp.ge.f32.partialorder %v69_v54, 0.0 }
  0x11   :  { %v100_v62 = vmul.f32 0.2, %v68_v53  ;;  %v101_v63 = vmul.f32 0.2, %v69_v54  ;;  %v71_v0 = vadd.f32 %v325_v5, %v48_v55  ;;  %vm86_vm10 = vcmp.ge.f32.partialorder %v70_v57, 0.0 }
  0x12   :  { %v102_v1 = vmul.f32 0.2, %v70_v57  ;;  %284 = vst [vmem:[%s426_s3 + $0x18] sm:$0xff] %v260_v61   ;;  %v72_v4 = vadd.f32 %v325_v5, %v49_v58  ;;  %v73_v6 = vadd.f32 %v325_v5, %v50_v59  ;;  %v51_v8 = vmul.f32 %v318_v2, %v28_v60 }
  0x13   :  { %v116_v3 = vsel %vm84_vm8, %v68_v53, %v100_v62  ;;  %v117_v9 = vsel %vm85_vm9, %v69_v54, %v101_v63  ;;  %vm87_vm11 = vcmp.ge.f32.partialorder %v71_v0, 0.0  ;;  %v103_v10 = vmul.f32 0.2, %v71_v0 }
  0x14   :  { %v118_v11 = vsel %vm86_vm10, %v70_v57, %v102_v1  ;;  %v265_v12 = vpack.c.bf16 %v117_v9, %v116_v3  ;;  %vm88_vm12 = vcmp.ge.f32.partialorder %v72_v4, 0.0  ;;  %vm89_vm13 = vcmp.ge.f32.partialorder %v73_v6, 0.0 }
  0x15   :  { %v104_v13 = vmul.f32 0.2, %v72_v4  ;;  %v119_v14 = vsel %vm87_vm11, %v71_v0, %v103_v10  ;;  %v105_v15 = vmul.f32 0.2, %v73_v6  ;;  %v52_v16 = vmul.f32 %v318_v2, %v29_v7 }
  0x16   :  { %v74_v17 = vadd.f32 %v325_v5, %v51_v8  ;;  %285 = vst [vmem:[%s426_s3 + $0x20] sm:$0xff] %v265_v12   ;;  %v270_v18 = vpack.c.bf16 %v119_v14, %v118_v11 }
  0x17   :  { %v120_v19 = vsel %vm88_vm12, %v72_v4, %v104_v13  ;;  %v121_v20 = vsel %vm89_vm13, %v73_v6, %v105_v15  ;;  %v75_v21 = vadd.f32 %v325_v5, %v52_v16 }
  0x18   :  { %vm90_vm14 = vcmp.ge.f32.partialorder %v74_v17, 0.0  ;;  %v106_v22 = vmul.f32 0.2, %v74_v17  ;;  %286 = vst [vmem:[%s426_s3 + $0x28] sm:$0xff] %v270_v18   ;;  %v275_v23 = vpack.c.bf16 %v121_v20, %v120_v19 }
  0x19   :  { %vm91_vm15 = vcmp.ge.f32.partialorder %v75_v21, 0.0  ;;  %v107_v2 = vmul.f32 0.2, %v75_v21 }
  0x1a   :  { %v122_v24 = vsel %vm90_vm14, %v74_v17, %v106_v22  ;;  %287 = vst [vmem:[%s426_s3 + $0x30] sm:$0xff] %v275_v23  }
  0x1b   :  { %v123_v25 = vsel %vm91_vm15, %v75_v21, %v107_v2 }
  0x1c   :  { %v280_v26 = vpack.c.bf16 %v123_v25, %v122_v24 }
  0x1e   :  { %288 = vst [vmem:[%s426_s3 + $0x38] sm:$0xff] %v280_v26  }

// kernel: _lambda_.12
= control target key start
LH: loop header
LB: loop body
LE: loop exit
PB: predicated region body
PF: predicated region fallthrough
CT: control target
= control target key end

     0   :  { %s141_s0 = inlined_call_operand.vmem [shape: f32[32,128], index: 0, kind: input, shape index: {}]   ;;  %s142_s1 = inlined_call_operand.vmem [shape: f32[1,128], index: 1, kind: input, shape index: {}]   ;;  %s143_s2 = inlined_call_operand.vmem [shape: f32[1,128], index: 2, kind: input, shape index: {}]   ;;  %s144_s3 = inlined_call_operand.vmem [shape: bf16[32,128], index: 3, kind: output, shape index: {}]  }
   0x1   :  { %v14_v0 = vld [vmem:[%s141_s0] sm:$0xff]  ;;  %v15_v1 = vld [vmem:[%s141_s0 + $0x8] sm:$0xff]  ;;  %v16_v6 = vld [vmem:[%s141_s0 + $0x10] sm:$0xff] }
   0x2   :  { %v76_v2 = vld [vmem:[%s142_s1] ss:$0 sm:$0xff]  ;;  %v17_v7 = vld [vmem:[%s141_s0 + $0x18] sm:$0xff] }
   0x3   :  { %v25_v3 = vmul.f32 %v76_v2, %v14_v0  ;;  %v26_v4 = vmul.f32 %v76_v2, %v15_v1  ;;  %v77_v5 = vld [vmem:[%s143_s2] ss:$0 sm:$0xff]  ;;  %v27_v8 = vmul.f32 %v76_v2, %v16_v6  ;;  %v28_v9 = vmul.f32 %v76_v2, %v17_v7 }
   0x5   :  { %v36_v10 = vadd.f32 %v77_v5, %v25_v3  ;;  %v37_v11 = vadd.f32 %v77_v5, %v26_v4  ;;  %v38_v12 = vadd.f32 %v77_v5, %v27_v8  ;;  %v39_v13 = vadd.f32 %v77_v5, %v28_v9 }
   0x7   :  { %vm40_vm0 = vcmp.ge.f32.partialorder %v36_v10, 0.0  ;;  %vm41_vm1 = vcmp.ge.f32.partialorder %v37_v11, 0.0  ;;  %v44_v14 = vmul.f32 0.2, %v36_v10  ;;  %v45_v15 = vmul.f32 0.2, %v37_v11 }
   0x8   :  { %vm42_vm2 = vcmp.ge.f32.partialorder %v38_v12, 0.0  ;;  %vm43_vm3 = vcmp.ge.f32.partialorder %v39_v13, 0.0  ;;  %v46_v16 = vmul.f32 0.2, %v38_v12  ;;  %v47_v17 = vmul.f32 0.2, %v39_v13 }
   0x9   :  { %v48_v18 = vsel %vm40_vm0, %v36_v10, %v44_v14  ;;  %v49_v19 = vsel %vm41_vm1, %v37_v11, %v45_v15 }
   0xa   :  { %v89_v20 = vpack.c.bf16 %v49_v19, %v48_v18  ;;  %v50_v21 = vsel %vm42_vm2, %v38_v12, %v46_v16  ;;  %v51_v22 = vsel %vm43_vm3, %v39_v13, %v47_v17 }
   0xb   :  { %v94_v23 = vpack.c.bf16 %v51_v22, %v50_v21 }
   0xc   :  { %90 = vst [vmem:[%s144_s3] sm:$0xff] %v89_v20  }
   0xd   :  { %96 = vst [vmem:[%s144_s3 + $0x8] sm:$0xff] %v94_v23  }

// kernel: _lambda_.13
= control target key start
LH: loop header
LB: loop body
LE: loop exit
PB: predicated region body
PF: predicated region fallthrough
CT: control target
= control target key end

     0   :  { %s1102_s15 = smov 0   ;;  %s1104_s16 = smov 0   ;;  %s1246_s0 = inlined_call_operand.vmem [shape: bf16[32,1024], index: 0, kind: input, shape index: {}]   ;;  %s1247_s1 = inlined_call_operand.vmem [shape: bf16[1024,128], index: 1, kind: input, shape index: {}]   ;;  %s1248_s2 = inlined_call_operand.vmem [shape: f32[32,128], index: 2, kind: output, shape index: {0}]   ;;  %s1249_s3 = inlined_call_operand.vmem [shape: f32[1,128], index: 3, kind: output, shape index: {1}]   ;;  %s1250_s4 = inlined_call_operand.vmem [shape: f32[1,128], index: 4, kind: output, shape index: {2}]  }
   0x1   :  { %s1106_s17 = smov 0   ;;  %s1108_s18 = smov 0  }
   0x2   :  { %s1110_s19 = smov 0  }
   0x3 LB: > { %s24_s20 = sadd.s32 1, %s1069_s18  ;;  %p43_p1 = scmp.ne.s32.totalorder %s1061_s16, %s1057_s15  ;;  %s1073_s19 = sphi %s1110_s19, %s15_s19   ;;  %s1069_s18 = sphi %s1108_s18, %s1254_s18   ;;  %s1065_s17 = sphi %s1106_s17, %s1253_s17   ;;  %s1061_s16 = sphi %s1104_s16, %s1252_s16   ;;  %s1057_s15 = sphi %s1102_s15, %s1251_s15  }
   0x4   : > { %p25_p0 = scmp.ge.s32.totalorder %s24_s20, 2  ;;  %p44_p2 = scmp.eq.s32.totalorder %s1073_s19, 0 }
   0x5   : > { %s36_s22 = sadd.s32 1, %s1061_s16  ;;  %p836_p5 = scmp.ge.s32.totalorder %s1073_s19, 2 }
   0x6   : > { %s1256_s20 = smov (%p25_p0, %s24_s20), 0  ;;  %p45_p3 = por %p44_p2, %p43_p1 }
   0x7   : > { %s32_s21 = ssub.s32 %s1069_s18, %s1256_s20  ;;  %163 = sbr.rel (%p836_p5) target bundleno = 22 (0x16), region = 16 }
   0x8   : > { %p34_p4 = scmp.eq.s32.totalorder %s32_s21, 0 }
   0xa   : > { %s1137_s23 = scalar_select %p34_p4, %s1061_s16, %s36_s22  }
   0xe   : > { %166 = sbr.rel (!%p45_p3) target bundleno = 22 (0x16), region = 20  ;;  %s168_s24 = sand.u32 (%p45_p3), 1, %s1061_s16  }
   0xf   : > { %s891_s25 = sshll.u32 (%p45_p3), %s1069_s18, 4  ;;  %s837_s26 = sshll.u32 (%p45_p3), %s168_s24, 6 }
  0x10   : > { %s176_s29 = scalar_lea.vmem (%p45_p3), %s1246_s0, %s891_s25  ;;  %s170_s30 = scalar_lea.vmem (%p45_p3), [#allocation3], %s837_s26 }
  0x11   : > { %v189_v0 = vld [vmem:[%s176_s29] sm:$0xff] (%p45_p3)  ;;  %v191_v1 = vld [vmem:[%s176_s29 + $0x8] sm:$0xff] (%p45_p3) }
  0x12   : > { %v193_v2 = vld [vmem:[%s176_s29 + $0x20] sm:$0xff] (%p45_p3)  ;;  %190 = vst [vmem:[%s170_s30] sm:$0xff] (%p45_p3), %v189_v0  ;;  %192 = vst [vmem:[%s170_s30 + $0x8] sm:$0xff] (%p45_p3), %v191_v1  ;;  %v195_v3 = vld [vmem:[%s176_s29 + $0x28] sm:$0xff] (%p45_p3) }
  0x13   : > { %194 = vst [vmem:[%s170_s30 + $0x10] sm:$0xff] (%p45_p3), %v193_v2  ;;  %v197_v4 = vld [vmem:[%s176_s29 + $0x40] sm:$0xff] (%p45_p3)  ;;  %v199_v5 = vld [vmem:[%s176_s29 + $0x48] sm:$0xff] (%p45_p3)  ;;  %196 = vst [vmem:[%s170_s30 + $0x18] sm:$0xff] (%p45_p3), %v195_v3 }
  0x14   : > { %198 = vst [vmem:[%s170_s30 + $0x20] sm:$0xff] (%p45_p3), %v197_v4  ;;  %200 = vst [vmem:[%s170_s30 + $0x28] sm:$0xff] (%p45_p3), %v199_v5  ;;  %v201_v6 = vld [vmem:[%s176_s29 + $0x60] sm:$0xff] (%p45_p3)  ;;  %v203_v7 = vld [vmem:[%s176_s29 + $0x68] sm:$0xff] (%p45_p3) }
  0x15   : > { %202 = vst [vmem:[%s170_s30 + $0x30] sm:$0xff] %v201_v6  ;;  %204 = vst [vmem:[%s170_s30 + $0x38] sm:$0xff] %v203_v7 }
  0x16 PF: > { %p840_p6 = scmp.ge.s32.totalorder %s1073_s19, 1  ;;  %p218_p7 = scmp.lt.s32.totalorder %s1073_s19, 3 }
  0x18   : > { %p219_p8 = pnand %p840_p6, %p218_p7 }
  0x19   : > { %s225_s5 = sand.u32 (!%p219_p8), 1, %s1057_s15   ;;  %s842_s6 = sshll.u32 (!%p219_p8), %s1065_s17, 6 }
  0x1a   : > { %222 = sbr.rel (%p219_p8) target bundleno = 331 (0x14b), region = 47  ;;  %s841_s7 = sshll.u32 (!%p219_p8), %s225_s5, 6 }
  0x1b   : > { %p258_p9 = scmp.lt.s32.totalorder (!%p219_p8), %s842_s6, 127  ;;  %p270_p10 = scmp.eq.s32.totalorder (!%p219_p8), %s1065_s17, 0 }
  0x1c   : > { %s1155_s12 = scalar_lea.vmem (!%p219_p8), [#allocation3], %s841_s7  ;;  %p844_p11 = scmp.ne.s32.totalorder (!%p219_p8), %s1065_s17, 0 }
  0x21   : > { %s1258_s6 = smov (!%p258_p9, %s842_s6), 127  ;;  %273 = sbr.rel (%p844_p11) target bundleno = 40 (0x28), region = 55 }
  0x22   : > { %s843_s8 = sshll.u32 %s1258_s6, 2  ;;  %v1075_v8 = vmov (!%p844_p11), 0.0  }
  0x23   : > { %s1153_s11 = scalar_lea.vmem %s1247_s1, %s843_s8  ;;  %274 = vst [vmem:[#allocation2] sm:$0xff] (!%p844_p11), %v1075_v8  ;;  %275 = vst [vmem:[#allocation2 + $0x8] sm:$0xff] (!%p844_p11), %v1075_v8 }
  0x24   : > { %276 = vst [vmem:[#allocation2 + $0x10] sm:$0xff] (!%p844_p11), %v1075_v8  ;;  %277 = vst [vmem:[#allocation2 + $0x18] sm:$0xff] (!%p844_p11), %v1075_v8 }
  0x28 PF: > { %v991_v9 = vld [vmem:[%s1153_s11 + $0x40] sm:$0xff]   ;;  %v995_v13 = vld [vmem:[%s1153_s11 + $0x48] sm:$0xff]   ;;  %v999_v17 = vld [vmem:[%s1153_s11 + $0x50] sm:$0xff]  }
  0x29   : > { %v992_v10 = vld [vmem:[%s1153_s11 + $0xc0] sm:$0xff]   ;;  %893 = vmatprep.subr.bf16.mxu0 %v991_v9  ;;  %v996_v14 = vld [vmem:[%s1153_s11 + $0xc8] sm:$0xff]   ;;  %v1000_v18 = vld [vmem:[%s1153_s11 + $0xd0] sm:$0xff]  }
  0x2a   : > { %v993_v11 = vld [vmem:[%s1153_s11] sm:$0xff]   ;;  %921 = vmatprep.subr.bf16.mxu1 %v992_v10  ;;  %v997_v15 = vld [vmem:[%s1153_s11 + $0x8] sm:$0xff]   ;;  %v1001_v19 = vld [vmem:[%s1153_s11 + $0x10] sm:$0xff]  }
  0x2b   : > { %v994_v12 = vld [vmem:[%s1153_s11 + $0x80] sm:$0xff]   ;;  %894 = vmatpush3.bf16.msra.mxu0 %v993_v11  ;;  %v998_v16 = vld [vmem:[%s1153_s11 + $0x88] sm:$0xff]   ;;  %v1002_v20 = vld [vmem:[%s1153_s11 + $0x90] sm:$0xff]  }
  0x2c   : > { %922 = vmatpush3.bf16.msra.mxu1 %v994_v12  ;;  %895 = vmatprep.subr.bf16.mxu0 %v995_v13  ;;  %v1003_v21 = vld [vmem:[%s1153_s11 + $0x58] sm:$0xff]   ;;  %v1007_v25 = vld [vmem:[%s1153_s11 + $0x60] sm:$0xff]   ;;  %v1011_v29 = vld [vmem:[%s1153_s11 + $0x68] sm:$0xff]  }
  0x2d   : > { %923 = vmatprep.subr.bf16.mxu1 %v996_v14  ;;  %v1004_v22 = vld [vmem:[%s1153_s11 + $0xd8] sm:$0xff]   ;;  %v1008_v26 = vld [vmem:[%s1153_s11 + $0xe0] sm:$0xff]   ;;  %v1012_v30 = vld [vmem:[%s1153_s11 + $0xe8] sm:$0xff]  }
  0x2e   : > { %v1005_v23 = vld [vmem:[%s1153_s11 + $0x18] sm:$0xff]   ;;  %v1009_v27 = vld [vmem:[%s1153_s11 + $0x20] sm:$0xff]   ;;  %v1013_v31 = vld [vmem:[%s1153_s11 + $0x28] sm:$0xff]  }
  0x2f   : > { %896 = vmatpush3.bf16.msra.mxu0 %v997_v15  ;;  %v1006_v24 = vld [vmem:[%s1153_s11 + $0x98] sm:$0xff]   ;;  %v1010_v28 = vld [vmem:[%s1153_s11 + $0xa0] sm:$0xff]   ;;  %v1014_v32 = vld [vmem:[%s1153_s11 + $0xa8] sm:$0xff]  }
  0x30   : > { %924 = vmatpush3.bf16.msra.mxu1 %v998_v16  ;;  %897 = vmatprep.subr.bf16.mxu0 %v999_v17  ;;  %v1015_v33 = vld [vmem:[%s1153_s11 + $0x70] sm:$0xff]   ;;  %v1019_v37 = vld [vmem:[%s1153_s11 + $0x78] sm:$0xff]   ;;  %v278_v58 = vld [vmem:[#allocation2] sm:$0xff] }
  0x31   : > { %925 = vmatprep.subr.bf16.mxu1 %v1000_v18  ;;  %v1016_v34 = vld [vmem:[%s1153_s11 + $0xf0] sm:$0xff]   ;;  %v1020_v38 = vld [vmem:[%s1153_s11 + $0xf8] sm:$0xff]   ;;  %v279_v63 = vld [vmem:[#allocation2 + $0x8] sm:$0xff] }
  0x32   : > { %v1017_v35 = vld [vmem:[%s1153_s11 + $0x30] sm:$0xff]   ;;  %v1021_v39 = vld [vmem:[%s1153_s11 + $0x38] sm:$0xff]  }
  0x33   : > { %898 = vmatpush3.bf16.msra.mxu0 %v1001_v19  ;;  %v1018_v36 = vld [vmem:[%s1153_s11 + $0xb0] sm:$0xff]   ;;  %v1022_v40 = vld [vmem:[%s1153_s11 + $0xb8] sm:$0xff]  }
  0x34   : > { %926 = vmatpush3.bf16.msra.mxu1 %v1002_v20  ;;  %899 = vmatprep.subr.bf16.mxu0 %v1003_v21  ;;  %v1023_v41 = vld [vmem:[%s1155_s12] ss:$16 sps:$4 sm:$0xff]   ;;  %v1025_v42 = vld [vmem:[%s1155_s12 + $0x4] ss:$16 sps:$4 sm:$0xff]   ;;  %v1026_v43 = vld [vmem:[%s1155_s12 + $0x8] ss:$16 sps:$4 sm:$0xff]  }
  0x35   : > { %927 = vmatprep.subr.bf16.mxu1 %v1004_v22  ;;  %v1028_v44 = vld [vmem:[%s1155_s12 + $0xc] ss:$16 sps:$4 sm:$0xff]   ;;  %618 = vmatprep.mubr.bf16.mxu0 %v1025_v42  ;;  %v1029_v45 = vld [vmem:[%s1155_s12 + $0x24] ss:$16 sps:$4 sm:$0xff]   ;;  %v1033_v47 = vld [vmem:[%s1155_s12 + $0x20] ss:$16 sps:$4 sm:$0xff]  }
  0x36   : > { %667 = vmatprep.mubr.bf16.mxu1 %v1028_v44  ;;  %v1031_v46 = vld [vmem:[%s1155_s12 + $0x2c] ss:$16 sps:$4 sm:$0xff]   ;;  %v1034_v48 = vld [vmem:[%s1155_s12 + $0x28] ss:$16 sps:$4 sm:$0xff]   ;;  %v280_v12 = vld [vmem:[#allocation2 + $0x10] sm:$0xff]  ;;  %v1076_v21 = vmov (%p270_p10), 0.0  }
  0x37   : > { %900 = vmatpush3.bf16.msra.mxu0 %v1005_v23  ;;  %v281_v17 = vld [vmem:[#allocation2 + $0x18] sm:$0xff]  ;;  %697 = vst [vmem:[%s1249_s3] sm:$0x1] (%p270_p10), %v1076_v21  ;;  %698 = vst [vmem:[%s1250_s4] sm:$0x1] (%p270_p10), %v1076_v21 }
  0x38   : > { %928 = vmatpush3.bf16.msra.mxu1 %v1006_v24  ;;  %901 = vmatprep.subr.bf16.mxu0 %v1007_v25 }
  0x39   : > { %929 = vmatprep.subr.bf16.mxu1 %v1008_v26 }
  0x3b   : > { %902 = vmatpush3.bf16.msra.mxu0 %v1009_v27 }
  0x3c   : > { %930 = vmatpush3.bf16.msra.mxu1 %v1010_v28  ;;  %903 = vmatprep.subr.bf16.mxu0 %v1011_v29 }
  0x3d   : > { %931 = vmatprep.subr.bf16.mxu1 %v1012_v30 }
  0x3f   : > { %904 = vmatpush3.bf16.msra.mxu0 %v1013_v31 }
  0x40   : > { %932 = vmatpush3.bf16.msra.mxu1 %v1014_v32  ;;  %905 = vmatprep.subr.bf16.mxu0 %v1015_v33 }
  0x41   : > { %933 = vmatprep.subr.bf16.mxu1 %v1016_v34 }
  0x43   : > { %906 = vmatpush3.bf16.msra.mxu0 %v1017_v35 }
  0x44   : > { %934 = vmatpush3.bf16.msra.mxu1 %v1018_v36  ;;  %907 = vmatprep.subr.bf16.mxu0 %v1019_v37 }
  0x45   : > { %935 = vmatprep.subr.bf16.mxu1 %v1020_v38 }
  0x47   : > { %908 = vmatpush3.bf16.msra.mxu0 %v1021_v39 }
  0x48   : > { %936 = vmatpush3.bf16.msra.mxu1 %v1022_v40 }
  0x4a   : > { %619 = vmatmul.mubr.bf16.vlgmr.msra.gmra.mrb[0].mxu0 %v1023_v41 }
  0x4b   : > { %668 = vmatmul.mubr.bf16.vlgmr.msra.gmra.mrb[0].mxu1 %v1026_v43  ;;  %626 = vmatprep.mubr.bf16.mxu0 %v1029_v45 }
  0x4c   : > { %675 = vmatprep.mubr.bf16.mxu1 %v1031_v46 }
  0x52   : > { %627 = vmatmul.mubr.bf16.gmra.mrb[4].mxu0 %v1033_v47 }
  0x53   : > { %676 = vmatmul.mubr.bf16.gmra.mrb[4].mxu1 %v1034_v48 }
 0x11d   : > { %v909_v49 = vpop.f32.mrb[0].mxu0 }
 0x11e   : > { %v937_v50 = vpop.f32.mrb[0].mxu1  ;;  %v910_v51 = vpop.f32.mrb[1].mxu0 }
 0x11f   : > { %v911_v52 = vadd.f32 %v910_v51, %v909_v49  ;;  %v938_v53 = vpop.f32.mrb[1].mxu1  ;;  %v912_v54 = vpop.f32.mrb[2].mxu0 }
 0x120   : > { %v939_v55 = vadd.f32 %v938_v53, %v937_v50  ;;  %v940_v56 = vpop.f32.mrb[2].mxu1  ;;  %v913_v57 = vpop.f32.mrb[3].mxu0 }
 0x121   : > { %v914_v59 = vadd.f32 %v913_v57, %v912_v54  ;;  %v941_v60 = vpop.f32.mrb[3].mxu1 }
 0x122   : > { %v670_v61 = vadd.f32 %v939_v55, %v911_v52  ;;  %v942_v62 = vadd.f32 %v941_v60, %v940_v56 }
 0x124   : > { %v684_v0 = vadd.f32 %v670_v61, %v278_v58  ;;  %v673_v1 = vadd.f32 %v942_v62, %v914_v59 }
 0x125   : > { %v915_v2 = vpop.f32.mrb[4].mxu0 }
 0x126   : > { %688 = vst [vmem:[#allocation2] sm:$0xff] %v684_v0  ;;  %v685_v3 = vadd.f32 %v673_v1, %v279_v63  ;;  %v943_v4 = vpop.f32.mrb[4].mxu1  ;;  %v916_v5 = vpop.f32.mrb[5].mxu0 }
 0x127   : > { %v917_v6 = vadd.f32 %v916_v5, %v915_v2  ;;  %v944_v7 = vpop.f32.mrb[5].mxu1  ;;  %v918_v8 = vpop.f32.mrb[6].mxu0 }
 0x128   : > { %689 = vst [vmem:[#allocation2 + $0x8] sm:$0xff] %v685_v3  ;;  %v945_v9 = vadd.f32 %v944_v7, %v943_v4  ;;  %v946_v10 = vpop.f32.mrb[6].mxu1  ;;  %v919_v11 = vpop.f32.mrb[7].mxu0 }
 0x129   : > { %v920_v13 = vadd.f32 %v919_v11, %v918_v8  ;;  %v947_v14 = vpop.f32.mrb[7].mxu1 }
 0x12a   : > { %v678_v15 = vadd.f32 %v945_v9, %v917_v6  ;;  %v948_v16 = vadd.f32 %v947_v14, %v946_v10  ;;  %696 = sbr.rel (!%p270_p10) target bundleno = 305 (0x131), region = 59 }
 0x12c   : > { %v686_v18 = vadd.f32 %v678_v15, %v280_v12  ;;  %v681_v19 = vadd.f32 %v948_v16, %v920_v13 }
 0x12e   : > { %690 = vst [vmem:[#allocation2 + $0x10] sm:$0xff] %v686_v18  ;;  %v687_v20 = vadd.f32 %v681_v19, %v281_v17 }
 0x130   : > { %691 = vst [vmem:[#allocation2 + $0x18] sm:$0xff] %v687_v20 }
 0x131 PF: > { %p886_p12 = scmp.ne.s32.totalorder %s1065_s17, 1 }
 0x132   : > { %v703_v22 = vld [vmem:[#allocation2] sm:$0xff] (!%p886_p12)  ;;  %v704_v23 = vld [vmem:[#allocation2 + $0x8] sm:$0xff] (!%p886_p12) }
 0x133   : > { %702 = sbr.rel (%p886_p12) target bundleno = 331 (0x14b), region = 63  ;;  %707 = vst [vmem:[%s1248_s2] sm:$0xff] (!%p886_p12), %v703_v22  ;;  %v724_v25 = vmul.f32 (!%p886_p12), %v703_v22, %v703_v22  ;;  %708 = vst [vmem:[%s1248_s2 + $0x8] sm:$0xff] (!%p886_p12), %v704_v23  ;;  %v712_v26 = vadd.f32 (!%p886_p12), %v704_v23, %v703_v22  ;;  %v725_v27 = vmul.f32 (!%p886_p12), %v704_v23, %v704_v23  ;;  %v711_v45 = vld [vmem:[%s1249_s3] sm:$0x1] (!%p886_p12) }
 0x134   : > { %v723_v48 = vld [vmem:[%s1250_s4] sm:$0x1] (!%p886_p12) }
 0x135   : > { %v705_v24 = vld [vmem:[#allocation2 + $0x10] sm:$0xff] (!%p886_p12)  ;;  %v728_v30 = vadd.f32 (!%p886_p12), %v725_v27, %v724_v25 }
 0x136   : > { %709 = vst [vmem:[%s1248_s2 + $0x10] sm:$0xff] (!%p886_p12), %v705_v24  ;;  %v726_v28 = vmul.f32 (!%p886_p12), %v705_v24, %v705_v24  ;;  %v713_v31 = vadd.f32 (!%p886_p12), %v712_v26, %v705_v24 }
 0x137   : > { %v706_v29 = vld [vmem:[#allocation2 + $0x18] sm:$0xff] (!%p886_p12) }
 0x138   : > { %710 = vst [vmem:[%s1248_s2 + $0x18] sm:$0xff] (!%p886_p12), %v706_v29  ;;  %v727_v32 = vmul.f32 (!%p886_p12), %v706_v29, %v706_v29  ;;  %v729_v33 = vadd.f32 (!%p886_p12), %v728_v30, %v726_v28  ;;  %v714_v34 = vadd.f32 (!%p886_p12), %v713_v31, %v706_v29 }
 0x13a   : > { %v715_v35 = vrot.slane %v714_v34, 4  ;;  %v730_v36 = vadd.f32 %v729_v33, %v727_v32 }
 0x13c   : > { %v716_v37 = vadd.f32 %v715_v35, %v714_v34  ;;  %v731_v38 = vrot.slane %v730_v36, 4 }
 0x13e   : > { %v717_v39 = vrot.slane %v716_v37, 2  ;;  %v732_v40 = vadd.f32 %v731_v38, %v730_v36 }
 0x140   : > { %v718_v41 = vadd.f32 %v717_v39, %v716_v37  ;;  %v733_v42 = vrot.slane %v732_v40, 2 }
 0x142   : > { %v719_v43 = vrot.slane %v718_v41, 1  ;;  %v734_v44 = vadd.f32 %v733_v42, %v732_v40 }
 0x144   : > { %v720_v46 = vadd.f32 %v719_v43, %v718_v41  ;;  %v735_v47 = vrot.slane %v734_v44, 1 }
 0x146   : > { %v721_v49 = vadd.f32 %v720_v46, %v711_v45  ;;  %v736_v50 = vadd.f32 %v735_v47, %v734_v44 }
 0x148   : > { %722 = vst [vmem:[%s1249_s3] sm:$0x1] %v721_v49  ;;  %v737_v51 = vadd.f32 %v736_v50, %v723_v48 }
 0x14a   : > { %738 = vst [vmem:[%s1250_s4] sm:$0x1] %v737_v51 }
 0x14b PF: > { %s15_s19 = sadd.s32 1, %s1073_s19   ;;  %s1251_s15 = smov %s1061_s16 }
 0x14c   : > { %p12_p13 = scmp.ge.s32.totalorder %s15_s19, 4   ;;  %s1252_s16 = smov %s1137_s23 }
 0x14d   : > { %s1253_s17 = smov %s1069_s18  ;;  %s1254_s18 = smov %s1256_s20 }
 0x14e   :  { %14 = sbr.rel (!%p12_p13) target bundleno = 3 (0x3), region = 117 }

// kernel: _lambda_.11
= control target key start
LH: loop header
LB: loop body
LE: loop exit
PB: predicated region body
PF: predicated region fallthrough
CT: control target
= control target key end

     0   :  { %v636_v40 = vmov 0.0   ;;  %s812_s1 = inlined_call_operand.vmem [shape: bf16[512,128], index: 1, kind: input, shape index: {}]   ;;  %s813_s0 = inlined_call_operand.vmem [shape: bf16[32,512], index: 0, kind: input, shape index: {}]   ;;  %s814_s3 = inlined_call_operand.vmem [shape: f32[1,128], index: 3, kind: output, shape index: {1}]   ;;  %s815_s4 = inlined_call_operand.vmem [shape: f32[1,128], index: 4, kind: output, shape index: {2}]   ;;  %s816_s2 = inlined_call_operand.vmem [shape: f32[32,128], index: 2, kind: output, shape index: {0}]  }
   0x1   :  { %v592_v0 = vld [vmem:[%s812_s1 + $0x40] sm:$0xff]   ;;  %v596_v4 = vld [vmem:[%s812_s1 + $0x48] sm:$0xff]   ;;  %v600_v8 = vld [vmem:[%s812_s1 + $0x50] sm:$0xff]   ;;  %442 = vst [vmem:[%s814_s3] sm:$0x1] %v636_v40 }
   0x2   :  { %v593_v1 = vld [vmem:[%s812_s1 + $0xc0] sm:$0xff]   ;;  %535 = vmatprep.subr.bf16.mxu0 %v592_v0  ;;  %v597_v5 = vld [vmem:[%s812_s1 + $0xc8] sm:$0xff]   ;;  %v601_v9 = vld [vmem:[%s812_s1 + $0xd0] sm:$0xff]   ;;  %443 = vst [vmem:[%s815_s4] sm:$0x1] %v636_v40 }
   0x3   :  { %v594_v2 = vld [vmem:[%s812_s1] sm:$0xff]   ;;  %563 = vmatprep.subr.bf16.mxu1 %v593_v1  ;;  %v598_v6 = vld [vmem:[%s812_s1 + $0x8] sm:$0xff]   ;;  %v602_v10 = vld [vmem:[%s812_s1 + $0x10] sm:$0xff]  }
   0x4   :  { %v595_v3 = vld [vmem:[%s812_s1 + $0x80] sm:$0xff]   ;;  %536 = vmatpush3.bf16.msra.mxu0 %v594_v2  ;;  %v599_v7 = vld [vmem:[%s812_s1 + $0x88] sm:$0xff]   ;;  %v603_v11 = vld [vmem:[%s812_s1 + $0x90] sm:$0xff]  }
   0x5   :  { %564 = vmatpush3.bf16.msra.mxu1 %v595_v3  ;;  %537 = vmatprep.subr.bf16.mxu0 %v596_v4  ;;  %v604_v12 = vld [vmem:[%s812_s1 + $0x58] sm:$0xff]   ;;  %v608_v16 = vld [vmem:[%s812_s1 + $0x60] sm:$0xff]   ;;  %v612_v20 = vld [vmem:[%s812_s1 + $0x68] sm:$0xff]  }
   0x6   :  { %565 = vmatprep.subr.bf16.mxu1 %v597_v5  ;;  %v605_v13 = vld [vmem:[%s812_s1 + $0xd8] sm:$0xff]   ;;  %v609_v17 = vld [vmem:[%s812_s1 + $0xe0] sm:$0xff]   ;;  %v613_v21 = vld [vmem:[%s812_s1 + $0xe8] sm:$0xff]  }
   0x7   :  { %v606_v14 = vld [vmem:[%s812_s1 + $0x18] sm:$0xff]   ;;  %v610_v18 = vld [vmem:[%s812_s1 + $0x20] sm:$0xff]   ;;  %v614_v22 = vld [vmem:[%s812_s1 + $0x28] sm:$0xff]  }
   0x8   :  { %538 = vmatpush3.bf16.msra.mxu0 %v598_v6  ;;  %v607_v15 = vld [vmem:[%s812_s1 + $0x98] sm:$0xff]   ;;  %v611_v19 = vld [vmem:[%s812_s1 + $0xa0] sm:$0xff]   ;;  %v615_v23 = vld [vmem:[%s812_s1 + $0xa8] sm:$0xff]  }
   0x9   :  { %566 = vmatpush3.bf16.msra.mxu1 %v599_v7  ;;  %539 = vmatprep.subr.bf16.mxu0 %v600_v8  ;;  %v616_v24 = vld [vmem:[%s812_s1 + $0x70] sm:$0xff]   ;;  %v620_v28 = vld [vmem:[%s812_s1 + $0x78] sm:$0xff]  }
   0xa   :  { %567 = vmatprep.subr.bf16.mxu1 %v601_v9  ;;  %v617_v25 = vld [vmem:[%s812_s1 + $0xf0] sm:$0xff]   ;;  %v621_v29 = vld [vmem:[%s812_s1 + $0xf8] sm:$0xff]  }
   0xb   :  { %v618_v26 = vld [vmem:[%s812_s1 + $0x30] sm:$0xff]   ;;  %v622_v30 = vld [vmem:[%s812_s1 + $0x38] sm:$0xff]  }
   0xc   :  { %540 = vmatpush3.bf16.msra.mxu0 %v602_v10  ;;  %v619_v27 = vld [vmem:[%s812_s1 + $0xb0] sm:$0xff]   ;;  %v623_v31 = vld [vmem:[%s812_s1 + $0xb8] sm:$0xff]  }
   0xd   :  { %568 = vmatpush3.bf16.msra.mxu1 %v603_v11  ;;  %541 = vmatprep.subr.bf16.mxu0 %v604_v12  ;;  %v624_v32 = vld [vmem:[%s813_s0] ss:$16 sps:$4 sm:$0xff]   ;;  %v626_v33 = vld [vmem:[%s813_s0 + $0x4] ss:$16 sps:$4 sm:$0xff]   ;;  %v627_v34 = vld [vmem:[%s813_s0 + $0x8] ss:$16 sps:$4 sm:$0xff]  }
   0xe   :  { %569 = vmatprep.subr.bf16.mxu1 %v605_v13  ;;  %v629_v35 = vld [vmem:[%s813_s0 + $0xc] ss:$16 sps:$4 sm:$0xff]   ;;  %363 = vmatprep.mubr.bf16.mxu0 %v626_v33  ;;  %v630_v36 = vld [vmem:[%s813_s0 + $0x24] ss:$16 sps:$4 sm:$0xff]   ;;  %v634_v38 = vld [vmem:[%s813_s0 + $0x20] ss:$16 sps:$4 sm:$0xff]  }
   0xf   :  { %412 = vmatprep.mubr.bf16.mxu1 %v629_v35  ;;  %v632_v37 = vld [vmem:[%s813_s0 + $0x2c] ss:$16 sps:$4 sm:$0xff]   ;;  %v635_v39 = vld [vmem:[%s813_s0 + $0x28] ss:$16 sps:$4 sm:$0xff]  }
  0x10   :  { %542 = vmatpush3.bf16.msra.mxu0 %v606_v14 }
  0x11   :  { %570 = vmatpush3.bf16.msra.mxu1 %v607_v15  ;;  %543 = vmatprep.subr.bf16.mxu0 %v608_v16 }
  0x12   :  { %571 = vmatprep.subr.bf16.mxu1 %v609_v17 }
  0x14   :  { %544 = vmatpush3.bf16.msra.mxu0 %v610_v18 }
  0x15   :  { %572 = vmatpush3.bf16.msra.mxu1 %v611_v19  ;;  %545 = vmatprep.subr.bf16.mxu0 %v612_v20 }
  0x16   :  { %573 = vmatprep.subr.bf16.mxu1 %v613_v21 }
  0x18   :  { %546 = vmatpush3.bf16.msra.mxu0 %v614_v22 }
  0x19   :  { %574 = vmatpush3.bf16.msra.mxu1 %v615_v23  ;;  %547 = vmatprep.subr.bf16.mxu0 %v616_v24  ;;  %v455_v24 = vld [vmem:[%s814_s3] sm:$0x1] }
  0x1a   :  { %575 = vmatprep.subr.bf16.mxu1 %v617_v25 }
  0x1c   :  { %548 = vmatpush3.bf16.msra.mxu0 %v618_v26 }
  0x1d   :  { %576 = vmatpush3.bf16.msra.mxu1 %v619_v27  ;;  %549 = vmatprep.subr.bf16.mxu0 %v620_v28  ;;  %v467_v27 = vld [vmem:[%s815_s4] sm:$0x1] }
  0x1e   :  { %577 = vmatprep.subr.bf16.mxu1 %v621_v29 }
  0x20   :  { %550 = vmatpush3.bf16.msra.mxu0 %v622_v30 }
  0x21   :  { %578 = vmatpush3.bf16.msra.mxu1 %v623_v31 }
  0x23   :  { %364 = vmatmul.mubr.bf16.vlgmr.msra.gmra.mrb[0].mxu0 %v624_v32 }
  0x24   :  { %413 = vmatmul.mubr.bf16.vlgmr.msra.gmra.mrb[0].mxu1 %v627_v34  ;;  %371 = vmatprep.mubr.bf16.mxu0 %v630_v36 }
  0x25   :  { %420 = vmatprep.mubr.bf16.mxu1 %v632_v37 }
  0x2b   :  { %372 = vmatmul.mubr.bf16.gmra.mrb[4].mxu0 %v634_v38 }
  0x2c   :  { %421 = vmatmul.mubr.bf16.gmra.mrb[4].mxu1 %v635_v39 }
  0xf6   :  { %v551_v41 = vpop.f32.mrb[0].mxu0 }
  0xf7   :  { %v579_v42 = vpop.f32.mrb[0].mxu1  ;;  %v552_v43 = vpop.f32.mrb[1].mxu0 }
  0xf8   :  { %v553_v44 = vadd.f32 %v552_v43, %v551_v41  ;;  %v580_v45 = vpop.f32.mrb[1].mxu1  ;;  %v554_v46 = vpop.f32.mrb[2].mxu0 }
  0xf9   :  { %v581_v47 = vadd.f32 %v580_v45, %v579_v42  ;;  %v582_v48 = vpop.f32.mrb[2].mxu1  ;;  %v555_v49 = vpop.f32.mrb[3].mxu0 }
  0xfa   :  { %v556_v50 = vadd.f32 %v555_v49, %v554_v46  ;;  %v583_v51 = vpop.f32.mrb[3].mxu1 }
  0xfb   :  { %v415_v52 = vadd.f32 %v581_v47, %v553_v44  ;;  %v584_v53 = vadd.f32 %v583_v51, %v582_v48 }
  0xfd   :  { %451 = vst [vmem:[%s816_s2] sm:$0xff] %v415_v52  ;;  %v418_v54 = vadd.f32 %v584_v53, %v556_v50  ;;  %v468_v56 = vmul.f32 %v415_v52, %v415_v52 }
  0xfe   :  { %v557_v55 = vpop.f32.mrb[4].mxu0 }
  0xff   :  { %452 = vst [vmem:[%s816_s2 + $0x8] sm:$0xff] %v418_v54  ;;  %v456_v57 = vadd.f32 %v418_v54, %v415_v52  ;;  %v469_v58 = vmul.f32 %v418_v54, %v418_v54  ;;  %v585_v59 = vpop.f32.mrb[4].mxu1  ;;  %v558_v60 = vpop.f32.mrb[5].mxu0 }
 0x100   :  { %v559_v61 = vadd.f32 %v558_v60, %v557_v55  ;;  %v586_v62 = vpop.f32.mrb[5].mxu1  ;;  %v560_v63 = vpop.f32.mrb[6].mxu0 }
 0x101   :  { %v472_v0 = vadd.f32 %v469_v58, %v468_v56  ;;  %v587_v1 = vadd.f32 %v586_v62, %v585_v59  ;;  %v588_v2 = vpop.f32.mrb[6].mxu1  ;;  %v561_v3 = vpop.f32.mrb[7].mxu0 }
 0x102   :  { %v562_v4 = vadd.f32 %v561_v3, %v560_v63  ;;  %v589_v5 = vpop.f32.mrb[7].mxu1 }
 0x103   :  { %v423_v6 = vadd.f32 %v587_v1, %v559_v61  ;;  %v590_v7 = vadd.f32 %v589_v5, %v588_v2 }
 0x105   :  { %453 = vst [vmem:[%s816_s2 + $0x10] sm:$0xff] %v423_v6  ;;  %v457_v8 = vadd.f32 %v456_v57, %v423_v6  ;;  %v470_v9 = vmul.f32 %v423_v6, %v423_v6  ;;  %v426_v10 = vadd.f32 %v590_v7, %v562_v4 }
 0x107   :  { %v473_v11 = vadd.f32 %v472_v0, %v470_v9  ;;  %454 = vst [vmem:[%s816_s2 + $0x18] sm:$0xff] %v426_v10  ;;  %v458_v12 = vadd.f32 %v457_v8, %v426_v10  ;;  %v471_v13 = vmul.f32 %v426_v10, %v426_v10 }
 0x109   :  { %v459_v14 = vrot.slane %v458_v12, 4  ;;  %v474_v15 = vadd.f32 %v473_v11, %v471_v13 }
 0x10b   :  { %v460_v16 = vadd.f32 %v459_v14, %v458_v12  ;;  %v475_v17 = vrot.slane %v474_v15, 4 }
 0x10d   :  { %v461_v18 = vrot.slane %v460_v16, 2  ;;  %v476_v19 = vadd.f32 %v475_v17, %v474_v15 }
 0x10f   :  { %v462_v20 = vadd.f32 %v461_v18, %v460_v16  ;;  %v477_v21 = vrot.slane %v476_v19, 2 }
 0x111   :  { %v463_v22 = vrot.slane %v462_v20, 1  ;;  %v478_v23 = vadd.f32 %v477_v21, %v476_v19 }
 0x113   :  { %v464_v25 = vadd.f32 %v463_v22, %v462_v20  ;;  %v479_v26 = vrot.slane %v478_v23, 1 }
 0x115   :  { %v465_v28 = vadd.f32 %v464_v25, %v455_v24  ;;  %v480_v29 = vadd.f32 %v479_v26, %v478_v23 }
 0x117   :  { %466 = vst [vmem:[%s814_s3] sm:$0x1] %v465_v28  ;;  %v481_v30 = vadd.f32 %v480_v29, %v467_v27 }
 0x119   :  { %482 = vst [vmem:[%s815_s4] sm:$0x1] %v481_v30 }

// kernel: _lambda_.15
= control target key start
LH: loop header
LB: loop body
LE: loop exit
PB: predicated region body
PF: predicated region fallthrough
CT: control target
= control target key end

     0   :  { %s952_s12 = smov 0   ;;  %s954_s13 = smov 0   ;;  %s1068_s0 = inlined_call_operand.vmem [shape: bf16[16,2048], index: 0, kind: input, shape index: {}]   ;;  %s1069_s1 = inlined_call_operand.vmem [shape: bf16[2048,128], index: 1, kind: input, shape index: {}]   ;;  %s1070_s2 = inlined_call_operand.vmem [shape: f32[1,128], index: 2, kind: input, shape index: {}]   ;;  %s1071_s3 = inlined_call_operand.vmem [shape: f32[16,128], index: 3, kind: output, shape index: {}]  }
   0x1   :  { %s956_s14 = smov 0   ;;  %s958_s15 = smov 0  }
   0x2   :  { %s960_s16 = smov 0  }
   0x3 LB: > { %s22_s17 = sadd.s32 1, %s925_s15  ;;  %p41_p1 = scmp.ne.s32.totalorder %s917_s13, %s913_s12  ;;  %s929_s16 = sphi %s960_s16, %s13_s16   ;;  %s925_s15 = sphi %s958_s15, %s1075_s15   ;;  %s921_s14 = sphi %s956_s14, %s1074_s14   ;;  %s917_s13 = sphi %s954_s13, %s1073_s13   ;;  %s913_s12 = sphi %s952_s12, %s1072_s12  }
   0x4   : > { %p23_p0 = scmp.ge.s32.totalorder %s22_s17, 4  ;;  %p42_p2 = scmp.eq.s32.totalorder %s929_s16, 0 }
   0x5   : > { %s34_s19 = sadd.s32 1, %s917_s13  ;;  %p716_p5 = scmp.ge.s32.totalorder %s929_s16, 4 }
   0x6   : > { %s1077_s17 = smov (%p23_p0, %s22_s17), 0  ;;  %p43_p3 = por %p42_p2, %p41_p1 }
   0x7   : > { %s30_s18 = ssub.s32 %s925_s15, %s1077_s17  ;;  %143 = sbr.rel (%p716_p5) target bundleno = 21 (0x15), region = 20 }
   0x8   : > { %p32_p4 = scmp.eq.s32.totalorder %s30_s18, 0 }
   0xa   : > { %s987_s20 = scalar_select %p32_p4, %s917_s13, %s34_s19  }
   0xe   : > { %146 = sbr.rel (!%p43_p3) target bundleno = 21 (0x15), region = 24  ;;  %s148_s21 = sand.u32 (%p43_p3), 1, %s917_s13  }
   0xf   : > { %s767_s22 = sshll.u32 (%p43_p3), %s925_s15, 4  ;;  %s717_s23 = sshll.u32 (%p43_p3), %s148_s21, 5 }
  0x10   : > { %s156_s26 = scalar_lea.vmem (%p43_p3), %s1068_s0, %s767_s22  ;;  %s150_s27 = scalar_lea.vmem (%p43_p3), [#allocation3], %s717_s23 }
  0x11   : > { %v169_v0 = vld [vmem:[%s156_s26] sm:$0xff] (%p43_p3)  ;;  %v171_v1 = vld [vmem:[%s156_s26 + $0x8] sm:$0xff] (%p43_p3) }
  0x12   : > { %v173_v2 = vld [vmem:[%s156_s26 + $0x40] sm:$0xff] (%p43_p3)  ;;  %170 = vst [vmem:[%s150_s27] sm:$0xff] (%p43_p3), %v169_v0  ;;  %172 = vst [vmem:[%s150_s27 + $0x8] sm:$0xff] (%p43_p3), %v171_v1  ;;  %v175_v3 = vld [vmem:[%s156_s26 + $0x48] sm:$0xff] (%p43_p3) }
  0x13   : > { %174 = vst [vmem:[%s150_s27 + $0x10] sm:$0xff] (%p43_p3), %v173_v2  ;;  %176 = vst [vmem:[%s150_s27 + $0x18] sm:$0xff] (%p43_p3), %v175_v3 }
  0x15 PF: > { %p720_p6 = scmp.ge.s32.totalorder %s929_s16, 1  ;;  %p190_p7 = scmp.lt.s32.totalorder %s929_s16, 5 }
  0x17   : > { %p191_p8 = pnand %p720_p6, %p190_p7 }
  0x18   : > { %s197_s28 = sand.u32 (!%p191_p8), 1, %s913_s12   ;;  %s722_s29 = sshll.u32 (!%p191_p8), %s921_s14, 6 }
  0x19   : > { %194 = sbr.rel (%p191_p8) target bundleno = 306 (0x132), region = 51  ;;  %s721_s30 = sshll.u32 (!%p191_p8), %s197_s28, 5 }
  0x1a   : > { %p228_p9 = scmp.lt.s32.totalorder (!%p191_p8), %s722_s29, 255  ;;  %s1004_s8 = scalar_lea.vmem (!%p191_p8), [#allocation3], %s721_s30 }
  0x1b   : > { %p724_p10 = scmp.ne.s32.totalorder (!%p191_p8), %s921_s14, 0 }
  0x20   : > { %s1079_s29 = smov (!%p228_p9, %s722_s29), 255  ;;  %243 = sbr.rel (%p724_p10) target bundleno = 39 (0x27), region = 59 }
  0x21   : > { %s723_s4 = sshll.u32 %s1079_s29, 2  ;;  %v931_v4 = vmov (!%p724_p10), 0.0  }
  0x22   : > { %s1002_s7 = scalar_lea.vmem %s1069_s1, %s723_s4  ;;  %244 = vst [vmem:[#allocation2] sm:$0xff] (!%p724_p10), %v931_v4  ;;  %245 = vst [vmem:[#allocation2 + $0x8] sm:$0xff] (!%p724_p10), %v931_v4 }
  0x27 PF: > { %v853_v5 = vld [vmem:[%s1002_s7 + $0x40] sm:$0xff]   ;;  %v857_v9 = vld [vmem:[%s1002_s7 + $0x48] sm:$0xff]   ;;  %v861_v13 = vld [vmem:[%s1002_s7 + $0x50] sm:$0xff]   ;;  %p761_p11 = scmp.ne.s32.totalorder %s921_s14, 3 }
  0x28   : > { %v854_v6 = vld [vmem:[%s1002_s7 + $0xc0] sm:$0xff]   ;;  %768 = vmatprep.subr.bf16.mxu0 %v853_v5  ;;  %v858_v10 = vld [vmem:[%s1002_s7 + $0xc8] sm:$0xff]   ;;  %v862_v14 = vld [vmem:[%s1002_s7 + $0xd0] sm:$0xff]  }
  0x29   : > { %v855_v7 = vld [vmem:[%s1002_s7] sm:$0xff]   ;;  %790 = vmatprep.subr.bf16.mxu1 %v854_v6  ;;  %v859_v11 = vld [vmem:[%s1002_s7 + $0x8] sm:$0xff]   ;;  %v863_v15 = vld [vmem:[%s1002_s7 + $0x10] sm:$0xff]  }
  0x2a   : > { %v856_v8 = vld [vmem:[%s1002_s7 + $0x80] sm:$0xff]   ;;  %769 = vmatpush3.bf16.msra.mxu0 %v855_v7  ;;  %v860_v12 = vld [vmem:[%s1002_s7 + $0x88] sm:$0xff]   ;;  %v864_v16 = vld [vmem:[%s1002_s7 + $0x90] sm:$0xff]  }
  0x2b   : > { %791 = vmatpush3.bf16.msra.mxu1 %v856_v8  ;;  %770 = vmatprep.subr.bf16.mxu0 %v857_v9  ;;  %v865_v17 = vld [vmem:[%s1002_s7 + $0x58] sm:$0xff]   ;;  %v869_v21 = vld [vmem:[%s1002_s7 + $0x60] sm:$0xff]   ;;  %v873_v25 = vld [vmem:[%s1002_s7 + $0x68] sm:$0xff]  }
  0x2c   : > { %792 = vmatprep.subr.bf16.mxu1 %v858_v10  ;;  %v866_v18 = vld [vmem:[%s1002_s7 + $0xd8] sm:$0xff]   ;;  %v870_v22 = vld [vmem:[%s1002_s7 + $0xe0] sm:$0xff]   ;;  %v874_v26 = vld [vmem:[%s1002_s7 + $0xe8] sm:$0xff]  }
  0x2d   : > { %v867_v19 = vld [vmem:[%s1002_s7 + $0x18] sm:$0xff]   ;;  %v871_v23 = vld [vmem:[%s1002_s7 + $0x20] sm:$0xff]   ;;  %v875_v27 = vld [vmem:[%s1002_s7 + $0x28] sm:$0xff]  }
  0x2e   : > { %771 = vmatpush3.bf16.msra.mxu0 %v859_v11  ;;  %v868_v20 = vld [vmem:[%s1002_s7 + $0x98] sm:$0xff]   ;;  %v872_v24 = vld [vmem:[%s1002_s7 + $0xa0] sm:$0xff]   ;;  %v876_v28 = vld [vmem:[%s1002_s7 + $0xa8] sm:$0xff]  }
  0x2f   : > { %793 = vmatpush3.bf16.msra.mxu1 %v860_v12  ;;  %772 = vmatprep.subr.bf16.mxu0 %v861_v13  ;;  %v877_v29 = vld [vmem:[%s1002_s7 + $0x70] sm:$0xff]   ;;  %v881_v33 = vld [vmem:[%s1002_s7 + $0x78] sm:$0xff]   ;;  %v246_v50 = vld [vmem:[#allocation2] sm:$0xff] }
  0x30   : > { %794 = vmatprep.subr.bf16.mxu1 %v862_v14  ;;  %v878_v30 = vld [vmem:[%s1002_s7 + $0xf0] sm:$0xff]   ;;  %v882_v34 = vld [vmem:[%s1002_s7 + $0xf8] sm:$0xff]   ;;  %v247_v55 = vld [vmem:[#allocation2 + $0x8] sm:$0xff] }
  0x31   : > { %v879_v31 = vld [vmem:[%s1002_s7 + $0x30] sm:$0xff]   ;;  %v883_v35 = vld [vmem:[%s1002_s7 + $0x38] sm:$0xff]   ;;  %v762_v60 = vld [vmem:[%s1070_s2] ss:$0 sm:$0xff] (!%p761_p11) }
  0x32   : > { %773 = vmatpush3.bf16.msra.mxu0 %v863_v15  ;;  %v880_v32 = vld [vmem:[%s1002_s7 + $0xb0] sm:$0xff]   ;;  %v884_v36 = vld [vmem:[%s1002_s7 + $0xb8] sm:$0xff]  }
  0x33   : > { %795 = vmatpush3.bf16.msra.mxu1 %v864_v16  ;;  %774 = vmatprep.subr.bf16.mxu0 %v865_v17  ;;  %v885_v37 = vld [vmem:[%s1004_s8] ss:$16 sps:$4 sm:$0xff]   ;;  %v887_v38 = vld [vmem:[%s1004_s8 + $0x4] ss:$16 sps:$4 sm:$0xff]   ;;  %v888_v39 = vld [vmem:[%s1004_s8 + $0x8] ss:$16 sps:$4 sm:$0xff]  }
  0x34   : > { %796 = vmatprep.subr.bf16.mxu1 %v866_v18  ;;  %v890_v40 = vld [vmem:[%s1004_s8 + $0xc] ss:$16 sps:$4 sm:$0xff]   ;;  %560 = vmatprep.mubr.bf16.mxu0 %v887_v38 }
  0x35   : > { %601 = vmatprep.mubr.bf16.mxu1 %v890_v40 }
  0x36   : > { %775 = vmatpush3.bf16.msra.mxu0 %v867_v19 }
  0x37   : > { %797 = vmatpush3.bf16.msra.mxu1 %v868_v20  ;;  %776 = vmatprep.subr.bf16.mxu0 %v869_v21 }
  0x38   : > { %798 = vmatprep.subr.bf16.mxu1 %v870_v22 }
  0x3a   : > { %777 = vmatpush3.bf16.msra.mxu0 %v871_v23 }
  0x3b   : > { %799 = vmatpush3.bf16.msra.mxu1 %v872_v24  ;;  %778 = vmatprep.subr.bf16.mxu0 %v873_v25 }
  0x3c   : > { %800 = vmatprep.subr.bf16.mxu1 %v874_v26 }
  0x3e   : > { %779 = vmatpush3.bf16.msra.mxu0 %v875_v27 }
  0x3f   : > { %801 = vmatpush3.bf16.msra.mxu1 %v876_v28  ;;  %780 = vmatprep.subr.bf16.mxu0 %v877_v29 }
  0x40   : > { %802 = vmatprep.subr.bf16.mxu1 %v878_v30 }
  0x42   : > { %781 = vmatpush3.bf16.msra.mxu0 %v879_v31 }
  0x43   : > { %803 = vmatpush3.bf16.msra.mxu1 %v880_v32  ;;  %782 = vmatprep.subr.bf16.mxu0 %v881_v33 }
  0x44   : > { %804 = vmatprep.subr.bf16.mxu1 %v882_v34 }
  0x46   : > { %783 = vmatpush3.bf16.msra.mxu0 %v883_v35 }
  0x47   : > { %805 = vmatpush3.bf16.msra.mxu1 %v884_v36 }
  0x49   : > { %561 = vmatmul.mubr.bf16.vlgmr.msra.gmra.mrb[0].mxu0 %v885_v37 }
  0x4a   : > { %602 = vmatmul.mubr.bf16.vlgmr.msra.gmra.mrb[0].mxu1 %v888_v39 }
 0x11c   : > { %v784_v41 = vpop.f32.mrb[0].mxu0 }
 0x11d   : > { %v806_v42 = vpop.f32.mrb[0].mxu1  ;;  %v785_v43 = vpop.f32.mrb[1].mxu0 }
 0x11e   : > { %v786_v44 = vadd.f32 %v785_v43, %v784_v41  ;;  %v807_v45 = vpop.f32.mrb[1].mxu1  ;;  %v787_v46 = vpop.f32.mrb[2].mxu0 }
 0x11f   : > { %v808_v47 = vadd.f32 %v807_v45, %v806_v42  ;;  %v809_v48 = vpop.f32.mrb[2].mxu1  ;;  %v788_v49 = vpop.f32.mrb[3].mxu0 }
 0x120   : > { %v789_v51 = vadd.f32 %v788_v49, %v787_v46  ;;  %v810_v52 = vpop.f32.mrb[3].mxu1 }
 0x121   : > { %v604_v53 = vadd.f32 %v808_v47, %v786_v44  ;;  %v811_v54 = vadd.f32 %v810_v52, %v809_v48  ;;  %617 = sbr.rel (%p761_p11) target bundleno = 306 (0x132), region = 63 }
 0x123   : > { %v610_v56 = vadd.f32 %v604_v53, %v246_v50  ;;  %v607_v57 = vadd.f32 %v811_v54, %v789_v51 }
 0x125   : > { %612 = vst [vmem:[#allocation2] sm:$0xff] %v610_v56  ;;  %v611_v58 = vadd.f32 %v607_v57, %v247_v55 }
 0x127   : > { %613 = vst [vmem:[#allocation2 + $0x8] sm:$0xff] %v611_v58 }
 0x12c   : > { %v618_v59 = vld [vmem:[#allocation2] sm:$0xff] }
 0x12d   : > { %v627_v62 = vadd.f32 %v762_v60, %v618_v59 }
 0x12e   : > { %v619_v61 = vld [vmem:[#allocation2 + $0x8] sm:$0xff] }
 0x12f   : > { %v628_v63 = vadd.f32 %v762_v60, %v619_v61  ;;  %629 = vst [vmem:[%s1071_s3] sm:$0xff] %v627_v62 }
 0x131   : > { %630 = vst [vmem:[%s1071_s3 + $0x8] sm:$0xff] %v628_v63 }
 0x132 PF: > { %s13_s16 = sadd.s32 1, %s929_s16   ;;  %s1072_s12 = smov %s917_s13 }
 0x133   : > { %p10_p12 = scmp.ge.s32.totalorder %s13_s16, 6   ;;  %s1073_s13 = smov %s987_s20 }
 0x134   : > { %s1074_s14 = smov %s925_s15  ;;  %s1075_s15 = smov %s1077_s17 }
 0x135   :  { %12 = sbr.rel (!%p10_p12) target bundleno = 3 (0x3), region = 101 }

</bundles_post_ra>
